<compile_context>
chip_gen: v6e
topology: v6e:2x2x1
jax: 0.10.0
libtpu: 0.0.40
codegen_flags: <defaults>
</compile_context>

<pallas_src>
import functools

import jax
import jax.numpy as jnp
from jax import lax
from jax.experimental import pallas as pl
from jax.experimental.pallas import tpu as pltpu

LANE = 128


def _round_up(x, m):
    return ((x + m - 1) // m) * m


def _pick_t_block(T, max_unroll=16):
    """Largest time-tile <= max_unroll that divides T and keeps blocks legal."""
    if T <= max_unroll:
        return T
    for tb in range(max_unroll, 7, -1):
        if T % tb == 0 and tb % 8 == 0:
            return tb
    return T  # fall back: whole sequence resident (still correct)


def rnn_init_encoder_kernel(embeds_ref, w_ht_ref, b_ht_ref,
                            seq_ref, w_ih_ref, w_hh_ref, b_ih_ref, b_hh_ref,
                            out_ref, hid_ref, h_ref, *, h_pad, t_block):
    """One (batch_tile, time_tile) grid step of: embed_to_ht linear + GRU recurrence.

    seq_ref : [1, Tb*Bb, F]   time-major rows (t major, b minor) for this tile
    out_ref : [Bb, Tb, Hpad]  batch-first output tile (lane-dense, Hpad % 128 == 0)
    h_ref   : [Bb, Hpad]      VMEM scratch carrying h across time tiles
    """
    t_idx = pl.program_id(1)
    Bb = h_ref.shape[0]

    # ---- initial hidden state h0 = embeds @ W_ht + b_ht (only at first time tile)
    @pl.when(t_idx == 0)
    def _init():
        h_ref[...] = (jnp.dot(embeds_ref[...], w_ht_ref[...],
                              preferred_element_type=jnp.float32)
                      + b_ht_ref[...])

    # ---- hoisted input projection: one matmul for all Tb timesteps of the tile
    x_flat = seq_ref[0]                                        # [Tb*Bb, F]
    gi_all = (jnp.dot(x_flat, w_ih_ref[...],
                      preferred_element_type=jnp.float32)
              + b_ih_ref[...])                                 # [Tb*Bb, 3*Hpad]

    # ---- hoisted recurrent weights / bias broadcast (not re-issued per step)
    w_hh = w_hh_ref[...]                                       # [Hpad, 3*Hpad]
    b_hh = jnp.broadcast_to(b_hh_ref[...], (Bb, 3 * h_pad))    # [Bb, 3*Hpad]

    # ---- GRU recurrence (PyTorch gate order r, z, n), statically unrolled
    h = h_ref[...]
    for t in range(t_block):
        gi = gi_all[t * Bb:(t + 1) * Bb, :]                    # [Bb, 3*Hpad]
        gh = jnp.dot(h, w_hh, preferred_element_type=jnp.float32) + b_hh
        # gate slices are lane-aligned (h_pad is a multiple of 128)
        r = jax.nn.sigmoid(gi[:, 0:h_pad] + gh[:, 0:h_pad])
        z = jax.nn.sigmoid(gi[:, h_pad:2 * h_pad] + gh[:, h_pad:2 * h_pad])
        n = jnp.tanh(gi[:, 2 * h_pad:] + r * gh[:, 2 * h_pad:])
        h = (1.0 - z) * n + z * h                              # [Bb, Hpad]
        out_ref[:, t, :] = h                                   # lane-dense store

    h_ref[...] = h                                             # carry to next tile

    @pl.when(t_idx == pl.num_programs(1) - 1)
    def _final():
        hid_ref[...] = h


def rnn_init_encoder(input_seq, input_cat, params, *, hidden_size):
    """Embedding gathers (JAX glue) + one gridded pallas_call (linear + GRU)."""
    # Embedding lookups (gather) — glue in plain JAX.
    embeds = jnp.concatenate(
        [tbl[input_cat[:, i]] for i, tbl in enumerate(params["embed_tables"])],
        axis=1).astype(jnp.float32)                            # [B, E]

    if input_seq.ndim < 3:                                     # mirrors unsqueeze_(2)
        input_seq = input_seq[..., None]
    B, T, F = input_seq.shape
    H = hidden_size
    H_pad = _round_up(H, LANE)
    pad = H_pad - H
    E = embeds.shape[1]

    # ---- zero-pad weights so each gate occupies a lane-aligned 128-multiple block.
    # Padded hidden columns stay exactly 0 through the recurrence (zero weights/bias
    # + zero h0 padding), so real columns are bit-for-bit the unpadded math.
    def pad_gates(w):                                          # [..., 3H] -> [..., 3*H_pad]
        lead = w.shape[:-1]
        w3 = w.reshape(lead + (3, H))
        w3 = jnp.pad(w3, [(0, 0)] * len(lead) + [(0, 0), (0, pad)])
        return w3.reshape(lead + (3 * H_pad,))

    w_ih = pad_gates(params["w_ih"].astype(jnp.float32))                       # [F, 3*H_pad]
    w_hh = pad_gates(jnp.pad(params["w_hh"].astype(jnp.float32),
                             ((0, pad), (0, 0))))                              # [H_pad, 3*H_pad]
    b_ih = pad_gates(params["b_ih"].astype(jnp.float32))                       # [1, 3*H_pad]
    b_hh = pad_gates(params["b_hh"].astype(jnp.float32))                       # [1, 3*H_pad]
    w_ht = jnp.pad(params["w_ht"].astype(jnp.float32), ((0, 0), (0, pad)))     # [E, H_pad]
    b_ht = jnp.pad(params["b_ht"].astype(jnp.float32), ((0, 0), (0, pad)))     # [1, H_pad]

    # ---- tiling
    Tb = _pick_t_block(T)
    Bb = B // 2 if (B % 16 == 0) else B        # split batch across v7x's 2 TCs when big enough
    nt = T // Tb
    nb = B // Bb

    # seq reordered so each (batch_tile, time_tile) block is a contiguous 2-D slab:
    # [nb, T*Bb, F], rows t-major / b-minor within a batch tile (tiny tensor, F features).
    seq_r = (jnp.transpose(input_seq.astype(jnp.float32), (1, 0, 2))   # [T, B, F]
             .reshape(T, nb, Bb, F)
             .transpose(1, 0, 2, 3)
             .reshape(nb, T * Bb, F))

    kernel = functools.partial(rnn_init_encoder_kernel, h_pad=H_pad, t_block=Tb)

    flops = (2 * B * E * H_pad                       # embed_to_ht
             + 2 * T * B * F * 3 * H_pad             # input projection
             + 2 * T * B * H_pad * 3 * H_pad)        # recurrent matmuls
    transcendentals = 3 * T * B * H_pad              # 2x sigmoid + tanh per step
    bytes_accessed = 4 * (T * B * F + B * E
                          + E * H_pad + H_pad
                          + F * 3 * H_pad + H_pad * 3 * H_pad + 2 * 3 * H_pad
                          + B * T * H_pad + B * H_pad)

    grid_spec = pltpu.PrefetchScalarGridSpec(
        num_scalar_prefetch=0,
        grid=(nb, nt),
        in_specs=[
            pl.BlockSpec((Bb, E), lambda b, t: (b, 0)),                 # embeds
            pl.BlockSpec((E, H_pad), lambda b, t: (0, 0)),              # w_ht
            pl.BlockSpec((1, H_pad), lambda b, t: (0, 0)),              # b_ht
            pl.BlockSpec((1, Tb * Bb, F), lambda b, t: (b, t, 0)),      # seq tile
            pl.BlockSpec((F, 3 * H_pad), lambda b, t: (0, 0)),          # w_ih
            pl.BlockSpec((H_pad, 3 * H_pad), lambda b, t: (0, 0)),      # w_hh
            pl.BlockSpec((1, 3 * H_pad), lambda b, t: (0, 0)),          # b_ih
            pl.BlockSpec((1, 3 * H_pad), lambda b, t: (0, 0)),          # b_hh
        ],
        out_specs=(
            pl.BlockSpec((Bb, Tb, H_pad), lambda b, t: (b, t, 0)),      # gru_out (batch-first)
            pl.BlockSpec((Bb, H_pad), lambda b, t: (b, 0)),             # hidden
        ),
        scratch_shapes=[pltpu.VMEM((Bb, H_pad), jnp.float32)],          # h carry
    )

    out_pad, hid_pad = pl.pallas_call(
        kernel,
        out_shape=(jax.ShapeDtypeStruct((B, T, H_pad), jnp.float32),
                   jax.ShapeDtypeStruct((B, H_pad), jnp.float32)),
        grid_spec=grid_spec,
        compiler_params=pltpu.CompilerParams(
            dimension_semantics=("parallel", "arbitrary"),
            vmem_limit_bytes=32 * 1024 * 1024),
        cost_estimate=pl.CostEstimate(flops=flops,
                                      transcendentals=transcendentals,
                                      bytes_accessed=bytes_accessed),
    )(embeds, w_ht, b_ht, seq_r, w_ih, w_hh, b_ih, b_hh)

    # Strip padding (no-op copy when H is already a multiple of 128).
    gru_out = out_pad[:, :, :H] if pad else out_pad
    hidden = hid_pad[:, :H] if pad else hid_pad
    return gru_out, hidden


def gru_reference(input_seq, input_cat, params, *, hidden_size):
    """Pure-JAX reference (same math as torch.nn.GRU, batch_first, 1 layer)."""
    embeds = jnp.concatenate(
        [tbl[input_cat[:, i]] for i, tbl in enumerate(params["embed_tables"])],
        axis=1).astype(jnp.float32)
    if input_seq.ndim < 3:
        input_seq = input_seq[..., None]
    H = hidden_size
    w_ih, w_hh = params["w_ih"], params["w_hh"]
    b_ih, b_hh = params["b_ih"], params["b_hh"]
    h0 = embeds @ params["w_ht"] + params["b_ht"]

    def step(h, x_t):
        gi = x_t @ w_ih + b_ih
        gh = h @ w_hh + b_hh
        r = jax.nn.sigmoid(gi[:, :H] + gh[:, :H])
        z = jax.nn.sigmoid(gi[:, H:2 * H] + gh[:, H:2 * H])
        n = jnp.tanh(gi[:, 2 * H:] + r * gh[:, 2 * H:])
        h_new = (1.0 - z) * n + z * h
        return h_new, h_new

    xs = jnp.transpose(input_seq.astype(jnp.float32), (1, 0, 2))
    h_final, outs = lax.scan(step, h0, xs)
    return jnp.transpose(outs, (1, 0, 2)), h_final


def init_params(key, embed_sizes, input_feature_len, hidden_size):
    """Deterministic synthetic parameters (same shapes as the PyTorch module)."""
    keys = jax.random.split(key, 8)
    embed_dim_sum = sum(d for _, d in embed_sizes)
    tables = []
    for i, (num_classes, out_size) in enumerate(embed_sizes):
        tables.append(0.1 * jax.random.normal(jax.random.fold_in(keys[0], i),
                                              (num_classes, out_size), jnp.float32))
    return {
        "embed_tables": tables,
        # Linear(embed_dim_sum -> H), stored transposed [E, H]; bias as [1, H].
        "w_ht": 0.1 * jax.random.normal(keys[1], (embed_dim_sum, hidden_size), jnp.float32),
        "b_ht": 0.1 * jax.random.normal(keys[2], (1, hidden_size), jnp.float32),
        # GRU weights (PyTorch: weight_ih_l0 (3H,F), weight_hh_l0 (3H,H)), transposed.
        "w_ih": 0.1 * jax.random.normal(keys[3], (input_feature_len, 3 * hidden_size), jnp.float32),
        "w_hh": 0.1 * jax.random.normal(keys[4], (hidden_size, 3 * hidden_size), jnp.float32),
        "b_ih": 0.1 * jax.random.normal(keys[5], (1, 3 * hidden_size), jnp.float32),
        "b_hh": 0.1 * jax.random.normal(keys[6], (1, 3 * hidden_size), jnp.float32),
    }


if __name__ == "__main__":
    # Small config consistent with the module (scaled down).
    embed_sizes = [(10, 4), (7, 3)]     # (num_classes, embed_dim)
    batch = 2
    seq_len = 8
    input_feature_len = 1
    hidden_size = 32

    key = jax.random.PRNGKey(0)
    k_param, k_seq, k_cat0, k_cat1 = jax.random.split(key, 4)

    params = init_params(k_param, embed_sizes, input_feature_len, hidden_size)

    input_seq = jax.random.normal(k_seq, (batch, seq_len, input_feature_len), jnp.float32)
    input_cat = jnp.stack(
        [jax.random.randint(k_cat0, (batch,), 0, embed_sizes[0][0]),
         jax.random.randint(k_cat1, (batch,), 0, embed_sizes[1][0])], axis=1)   # [B, 2]

    gru_out, hidden = rnn_init_encoder(input_seq, input_cat, params,
                                       hidden_size=hidden_size)
    jax.block_until_ready((gru_out, hidden))

    assert gru_out.shape == (batch, seq_len, hidden_size)
    assert hidden.shape == (batch, hidden_size)
    # Last GRU output step must equal the returned hidden state (1-layer, unidir).
    assert jnp.allclose(gru_out[:, -1, :], hidden, atol=1e-5)

    # Numerical check against a pure-JAX reference of the PyTorch math.
    ref_out, ref_hid = gru_reference(input_seq, input_cat, params,
                                     hidden_size=hidden_size)
    assert jnp.allclose(gru_out, ref_out, atol=1e-4, rtol=1e-4)
    assert jnp.allclose(hidden, ref_hid, atol=1e-4, rtol=1e-4)

    print("KERNEL_OK")
</pallas_src>

<mosaic_0001>
module attributes {stable_mosaic.version = 11 : i64} {
  func.func @rnn_init_encoder_kernel(%arg0: i32, %arg1: i32, %arg2: memref<2x7xf32, #tpu.memory_space<vmem>>, %arg3: memref<7x128xf32, #tpu.memory_space<vmem>>, %arg4: memref<1x128xf32, #tpu.memory_space<vmem>>, %arg5: memref<1x16x1xf32, #tpu.memory_space<vmem>>, %arg6: memref<1x384xf32, #tpu.memory_space<vmem>>, %arg7: memref<128x384xf32, #tpu.memory_space<vmem>>, %arg8: memref<1x384xf32, #tpu.memory_space<vmem>>, %arg9: memref<1x384xf32, #tpu.memory_space<vmem>>, %arg10: memref<2x8x128xf32, #tpu.memory_space<vmem>>, %arg11: memref<2x128xf32, #tpu.memory_space<vmem>>, %arg12: memref<2x128xf32, #tpu.memory_space<vmem>>) attributes {dimension_semantics = [#tpu.dimension_semantics<parallel>, #tpu.dimension_semantics<arbitrary>], iteration_bounds = array<i64: 1, 1>, scalar_prefetch = 0 : i64, scratch_operands = 1 : i64, tpu.core_type = #tpu.core_type<tc>, window_params = [{transform_indices = @transform_0, window_bounds = array<i64: 2, 7>}, {pipeline_mode = #tpu.pipeline_mode<synchronous>, transform_indices = @transform_1, window_bounds = array<i64: 7, 128>}, {pipeline_mode = #tpu.pipeline_mode<synchronous>, transform_indices = @transform_2, window_bounds = array<i64: 1, 128>}, {transform_indices = @transform_3, window_bounds = array<i64: 1, 16, 1>}, {pipeline_mode = #tpu.pipeline_mode<synchronous>, transform_indices = @transform_4, window_bounds = array<i64: 1, 384>}, {pipeline_mode = #tpu.pipeline_mode<synchronous>, transform_indices = @transform_5, window_bounds = array<i64: 128, 384>}, {pipeline_mode = #tpu.pipeline_mode<synchronous>, transform_indices = @transform_6, window_bounds = array<i64: 1, 384>}, {pipeline_mode = #tpu.pipeline_mode<synchronous>, transform_indices = @transform_7, window_bounds = array<i64: 1, 384>}, {transform_indices = @transform_8, window_bounds = array<i64: 2, 8, 128>}, {transform_indices = @transform_9, window_bounds = array<i64: 2, 128>}]} {
    %c0_i32 = arith.constant 0 : i32
    %0 = arith.cmpi eq, %arg1, %c0_i32 : i32
    %1 = arith.extui %0 : i1 to i32
    %c0_i32_0 = arith.constant 0 : i32
    %2 = arith.cmpi ne, %1, %c0_i32_0 : i32
    scf.if %2 {
      %c0_66 = arith.constant 0 : index
      %c0_67 = arith.constant 0 : index
      %275 = vector.load %arg2[%c0_66, %c0_67] : memref<2x7xf32, #tpu.memory_space<vmem>>, vector<2x7xf32>
      %c0_68 = arith.constant 0 : index
      %c0_69 = arith.constant 0 : index
      %276 = vector.load %arg3[%c0_68, %c0_69] : memref<7x128xf32, #tpu.memory_space<vmem>>, vector<7x128xf32>
      %cst_70 = arith.constant dense<0.000000e+00> : vector<2x128xf32>
      %277 = tpu.matmul %275, %276, %cst_70 {dimension_numbers = #tpu.dot_dimension_numbers<[1], [0], [0], [1], [0, 0, 1, 1], [], []>} : vector<2x7xf32>, vector<7x128xf32>, vector<2x128xf32> -> vector<2x128xf32>
      %c0_71 = arith.constant 0 : index
      %c0_72 = arith.constant 0 : index
      %278 = vector.load %arg4[%c0_71, %c0_72] : memref<1x128xf32, #tpu.memory_space<vmem>>, vector<1x128xf32>
      %279 = vector.broadcast %278 : vector<1x128xf32> to vector<2x128xf32>
      %280 = arith.addf %277, %279 : vector<2x128xf32>
      %c0_73 = arith.constant 0 : index
      %c0_74 = arith.constant 0 : index
      %281 = vector.load %arg12[%c0_73, %c0_74] : memref<2x128xf32, #tpu.memory_space<vmem>>, vector<2x128xf32>
      tpu.vector_store %arg12[%c0_73, %c0_74], %280 {strides = array<i32>} : memref<2x128xf32, #tpu.memory_space<vmem>>, vector<2x128xf32>,
    } else {
    }
    %c0 = arith.constant 0 : index
    %c0_1 = arith.constant 0 : index
    %c0_2 = arith.constant 0 : index
    %3 = vector.load %arg5[%c0, %c0_1, %c0_2] : memref<1x16x1xf32, #tpu.memory_space<vmem>>, vector<1x16x1xf32>
    %4 = vector.shape_cast %3 : vector<1x16x1xf32> to vector<16x1xf32>
    %c0_3 = arith.constant 0 : index
    %c0_4 = arith.constant 0 : index
    %5 = vector.load %arg6[%c0_3, %c0_4] : memref<1x384xf32, #tpu.memory_space<vmem>>, vector<1x384xf32>
    %cst = arith.constant dense<0.000000e+00> : vector<16x384xf32>
    %6 = tpu.matmul %4, %5, %cst {dimension_numbers = #tpu.dot_dimension_numbers<[1], [0], [0], [1], [0, 0, 1, 1], [], []>} : vector<16x1xf32>, vector<1x384xf32>, vector<16x384xf32> -> vector<16x384xf32>
    %c0_5 = arith.constant 0 : index
    %c0_6 = arith.constant 0 : index
    %7 = vector.load %arg8[%c0_5, %c0_6] : memref<1x384xf32, #tpu.memory_space<vmem>>, vector<1x384xf32>
    %8 = vector.broadcast %7 : vector<1x384xf32> to vector<16x384xf32>
    %9 = arith.addf %6, %8 : vector<16x384xf32>
    %c0_7 = arith.constant 0 : index
    %c0_8 = arith.constant 0 : index
    %10 = vector.load %arg7[%c0_7, %c0_8] : memref<128x384xf32, #tpu.memory_space<vmem>>, vector<128x384xf32>
    %c0_9 = arith.constant 0 : index
    %c0_10 = arith.constant 0 : index
    %11 = vector.load %arg9[%c0_9, %c0_10] : memref<1x384xf32, #tpu.memory_space<vmem>>, vector<1x384xf32>
    %12 = vector.shape_cast %11 : vector<1x384xf32> to vector<1x384xf32>
    %13 = vector.broadcast %12 : vector<1x384xf32> to vector<2x384xf32>
    %c0_11 = arith.constant 0 : index
    %c0_12 = arith.constant 0 : index
    %14 = vector.load %arg12[%c0_11, %c0_12] : memref<2x128xf32, #tpu.memory_space<vmem>>, vector<2x128xf32>
    %15 = vector.extract_strided_slice %9 {offsets = [0, 0], sizes = [2, 384], strides = [1, 1]} : vector<16x384xf32> to vector<2x384xf32>
    %cst_13 = arith.constant dense<0.000000e+00> : vector<2x384xf32>
    %16 = tpu.matmul %14, %10, %cst_13 {dimension_numbers = #tpu.dot_dimension_numbers<[1], [0], [0], [1], [0, 0, 1, 1], [], []>} : vector<2x128xf32>, vector<128x384xf32>, vector<2x384xf32> -> vector<2x384xf32>
    %17 = arith.addf %16, %13 : vector<2x384xf32>
    %18 = vector.extract_strided_slice %15 {offsets = [0, 0], sizes = [2, 128], strides = [1, 1]} : vector<2x384xf32> to vector<2x128xf32>
    %19 = vector.extract_strided_slice %17 {offsets = [0, 0], sizes = [2, 128], strides = [1, 1]} : vector<2x384xf32> to vector<2x128xf32>
    %20 = arith.addf %18, %19 : vector<2x128xf32>
    %21 = arith.negf %20 : vector<2x128xf32>
    %22 = math.exp %21 : vector<2x128xf32>
    %cst_14 = arith.constant 1.000000e+00 : f32
    %23 = vector.broadcast %cst_14 : f32 to vector<2x128xf32>
    %24 = arith.addf %23, %22 : vector<2x128xf32>
    %25 = arith.divf %23, %24 : vector<2x128xf32>
    %26 = vector.extract_strided_slice %15 {offsets = [0, 128], sizes = [2, 128], strides = [1, 1]} : vector<2x384xf32> to vector<2x128xf32>
    %27 = vector.extract_strided_slice %17 {offsets = [0, 128], sizes = [2, 128], strides = [1, 1]} : vector<2x384xf32> to vector<2x128xf32>
    %28 = arith.addf %26, %27 : vector<2x128xf32>
    %29 = arith.negf %28 : vector<2x128xf32>
    %30 = math.exp %29 : vector<2x128xf32>
    %cst_15 = arith.constant 1.000000e+00 : f32
    %31 = vector.broadcast %cst_15 : f32 to vector<2x128xf32>
    %32 = arith.addf %31, %30 : vector<2x128xf32>
    %33 = arith.divf %31, %32 : vector<2x128xf32>
    %34 = vector.extract_strided_slice %15 {offsets = [0, 256], sizes = [2, 128], strides = [1, 1]} : vector<2x384xf32> to vector<2x128xf32>
    %35 = vector.extract_strided_slice %17 {offsets = [0, 256], sizes = [2, 128], strides = [1, 1]} : vector<2x384xf32> to vector<2x128xf32>
    %36 = arith.mulf %25, %35 : vector<2x128xf32>
    %37 = arith.addf %34, %36 : vector<2x128xf32>
    %38 = math.tanh %37 : vector<2x128xf32>
    %cst_16 = arith.constant 1.000000e+00 : f32
    %39 = vector.broadcast %cst_16 : f32 to vector<2x128xf32>
    %40 = arith.subf %39, %33 : vector<2x128xf32>
    %41 = arith.mulf %40, %38 : vector<2x128xf32>
    %42 = arith.mulf %33, %14 : vector<2x128xf32>
    %43 = arith.addf %41, %42 : vector<2x128xf32>
    %c0_17 = arith.constant 0 : index
    %c0_18 = arith.constant 0 : index
    %c0_19 = arith.constant 0 : index
    %44 = vector.load %arg10[%c0_17, %c0_18, %c0_19] : memref<2x8x128xf32, #tpu.memory_space<vmem>>, vector<2x1x128xf32>
    %45 = vector.shape_cast %44 : vector<2x1x128xf32> to vector<2x128xf32>
    %46 = vector.shape_cast %43 : vector<2x128xf32> to vector<2x1x128xf32>
    tpu.vector_store %arg10[%c0_17, %c0_18, %c0_19], %46 {strides = array<i32>} : memref<2x8x128xf32, #tpu.memory_space<vmem>>, vector<2x1x128xf32>,
    %47 = vector.extract_strided_slice %9 {offsets = [2, 0], sizes = [2, 384], strides = [1, 1]} : vector<16x384xf32> to vector<2x384xf32>
    %cst_20 = arith.constant dense<0.000000e+00> : vector<2x384xf32>
    %48 = tpu.matmul %43, %10, %cst_20 {dimension_numbers = #tpu.dot_dimension_numbers<[1], [0], [0], [1], [0, 0, 1, 1], [], []>} : vector<2x128xf32>, vector<128x384xf32>, vector<2x384xf32> -> vector<2x384xf32>
    %49 = arith.addf %48, %13 : vector<2x384xf32>
    %50 = vector.extract_strided_slice %47 {offsets = [0, 0], sizes = [2, 128], strides = [1, 1]} : vector<2x384xf32> to vector<2x128xf32>
    %51 = vector.extract_strided_slice %49 {offsets = [0, 0], sizes = [2, 128], strides = [1, 1]} : vector<2x384xf32> to vector<2x128xf32>
    %52 = arith.addf %50, %51 : vector<2x128xf32>
    %53 = arith.negf %52 : vector<2x128xf32>
    %54 = math.exp %53 : vector<2x128xf32>
    %cst_21 = arith.constant 1.000000e+00 : f32
    %55 = vector.broadcast %cst_21 : f32 to vector<2x128xf32>
    %56 = arith.addf %55, %54 : vector<2x128xf32>
    %57 = arith.divf %55, %56 : vector<2x128xf32>
    %58 = vector.extract_strided_slice %47 {offsets = [0, 128], sizes = [2, 128], strides = [1, 1]} : vector<2x384xf32> to vector<2x128xf32>
    %59 = vector.extract_strided_slice %49 {offsets = [0, 128], sizes = [2, 128], strides = [1, 1]} : vector<2x384xf32> to vector<2x128xf32>
    %60 = arith.addf %58, %59 : vector<2x128xf32>
    %61 = arith.negf %60 : vector<2x128xf32>
    %62 = math.exp %61 : vector<2x128xf32>
    %cst_22 = arith.constant 1.000000e+00 : f32
    %63 = vector.broadcast %cst_22 : f32 to vector<2x128xf32>
    %64 = arith.addf %63, %62 : vector<2x128xf32>
    %65 = arith.divf %63, %64 : vector<2x128xf32>
    %66 = vector.extract_strided_slice %47 {offsets = [0, 256], sizes = [2, 128], strides = [1, 1]} : vector<2x384xf32> to vector<2x128xf32>
    %67 = vector.extract_strided_slice %49 {offsets = [0, 256], sizes = [2, 128], strides = [1, 1]} : vector<2x384xf32> to vector<2x128xf32>
    %68 = arith.mulf %57, %67 : vector<2x128xf32>
    %69 = arith.addf %66, %68 : vector<2x128xf32>
    %70 = math.tanh %69 : vector<2x128xf32>
    %cst_23 = arith.constant 1.000000e+00 : f32
    %71 = vector.broadcast %cst_23 : f32 to vector<2x128xf32>
    %72 = arith.subf %71, %65 : vector<2x128xf32>
    %73 = arith.mulf %72, %70 : vector<2x128xf32>
    %74 = arith.mulf %65, %43 : vector<2x128xf32>
    %75 = arith.addf %73, %74 : vector<2x128xf32>
    %c0_24 = arith.constant 0 : index
    %c1 = arith.constant 1 : index
    %c0_25 = arith.constant 0 : index
    %76 = vector.load %arg10[%c0_24, %c1, %c0_25] : memref<2x8x128xf32, #tpu.memory_space<vmem>>, vector<2x1x128xf32>
    %77 = vector.shape_cast %76 : vector<2x1x128xf32> to vector<2x128xf32>
    %78 = vector.shape_cast %75 : vector<2x128xf32> to vector<2x1x128xf32>
    tpu.vector_store %arg10[%c0_24, %c1, %c0_25], %78 {strides = array<i32>} : memref<2x8x128xf32, #tpu.memory_space<vmem>>, vector<2x1x128xf32>,
    %79 = vector.extract_strided_slice %9 {offsets = [4, 0], sizes = [2, 384], strides = [1, 1]} : vector<16x384xf32> to vector<2x384xf32>
    %cst_26 = arith.constant dense<0.000000e+00> : vector<2x384xf32>
    %80 = tpu.matmul %75, %10, %cst_26 {dimension_numbers = #tpu.dot_dimension_numbers<[1], [0], [0], [1], [0, 0, 1, 1], [], []>} : vector<2x128xf32>, vector<128x384xf32>, vector<2x384xf32> -> vector<2x384xf32>
    %81 = arith.addf %80, %13 : vector<2x384xf32>
    %82 = vector.extract_strided_slice %79 {offsets = [0, 0], sizes = [2, 128], strides = [1, 1]} : vector<2x384xf32> to vector<2x128xf32>
    %83 = vector.extract_strided_slice %81 {offsets = [0, 0], sizes = [2, 128], strides = [1, 1]} : vector<2x384xf32> to vector<2x128xf32>
    %84 = arith.addf %82, %83 : vector<2x128xf32>
    %85 = arith.negf %84 : vector<2x128xf32>
    %86 = math.exp %85 : vector<2x128xf32>
    %cst_27 = arith.constant 1.000000e+00 : f32
    %87 = vector.broadcast %cst_27 : f32 to vector<2x128xf32>
    %88 = arith.addf %87, %86 : vector<2x128xf32>
    %89 = arith.divf %87, %88 : vector<2x128xf32>
    %90 = vector.extract_strided_slice %79 {offsets = [0, 128], sizes = [2, 128], strides = [1, 1]} : vector<2x384xf32> to vector<2x128xf32>
    %91 = vector.extract_strided_slice %81 {offsets = [0, 128], sizes = [2, 128], strides = [1, 1]} : vector<2x384xf32> to vector<2x128xf32>
    %92 = arith.addf %90, %91 : vector<2x128xf32>
    %93 = arith.negf %92 : vector<2x128xf32>
    %94 = math.exp %93 : vector<2x128xf32>
    %cst_28 = arith.constant 1.000000e+00 : f32
    %95 = vector.broadcast %cst_28 : f32 to vector<2x128xf32>
    %96 = arith.addf %95, %94 : vector<2x128xf32>
    %97 = arith.divf %95, %96 : vector<2x128xf32>
    %98 = vector.extract_strided_slice %79 {offsets = [0, 256], sizes = [2, 128], strides = [1, 1]} : vector<2x384xf32> to vector<2x128xf32>
    %99 = vector.extract_strided_slice %81 {offsets = [0, 256], sizes = [2, 128], strides = [1, 1]} : vector<2x384xf32> to vector<2x128xf32>
    %100 = arith.mulf %89, %99 : vector<2x128xf32>
    %101 = arith.addf %98, %100 : vector<2x128xf32>
    %102 = math.tanh %101 : vector<2x128xf32>
    %cst_29 = arith.constant 1.000000e+00 : f32
    %103 = vector.broadcast %cst_29 : f32 to vector<2x128xf32>
    %104 = arith.subf %103, %97 : vector<2x128xf32>
    %105 = arith.mulf %104, %102 : vector<2x128xf32>
    %106 = arith.mulf %97, %75 : vector<2x128xf32>
    %107 = arith.addf %105, %106 : vector<2x128xf32>
    %c0_30 = arith.constant 0 : index
    %c2 = arith.constant 2 : index
    %c0_31 = arith.constant 0 : index
    %108 = vector.load %arg10[%c0_30, %c2, %c0_31] : memref<2x8x128xf32, #tpu.memory_space<vmem>>, vector<2x1x128xf32>
    %109 = vector.shape_cast %108 : vector<2x1x128xf32> to vector<2x128xf32>
    %110 = vector.shape_cast %107 : vector<2x128xf32> to vector<2x1x128xf32>
    tpu.vector_store %arg10[%c0_30, %c2, %c0_31], %110 {strides = array<i32>} : memref<2x8x128xf32, #tpu.memory_space<vmem>>, vector<2x1x128xf32>,
    %111 = vector.extract_strided_slice %9 {offsets = [6, 0], sizes = [2, 384], strides = [1, 1]} : vector<16x384xf32> to vector<2x384xf32>
    %cst_32 = arith.constant dense<0.000000e+00> : vector<2x384xf32>
    %112 = tpu.matmul %107, %10, %cst_32 {dimension_numbers = #tpu.dot_dimension_numbers<[1], [0], [0], [1], [0, 0, 1, 1], [], []>} : vector<2x128xf32>, vector<128x384xf32>, vector<2x384xf32> -> vector<2x384xf32>
    %113 = arith.addf %112, %13 : vector<2x384xf32>
    %114 = vector.extract_strided_slice %111 {offsets = [0, 0], sizes = [2, 128], strides = [1, 1]} : vector<2x384xf32> to vector<2x128xf32>
    %115 = vector.extract_strided_slice %113 {offsets = [0, 0], sizes = [2, 128], strides = [1, 1]} : vector<2x384xf32> to vector<2x128xf32>
    %116 = arith.addf %114, %115 : vector<2x128xf32>
    %117 = arith.negf %116 : vector<2x128xf32>
    %118 = math.exp %117 : vector<2x128xf32>
    %cst_33 = arith.constant 1.000000e+00 : f32
    %119 = vector.broadcast %cst_33 : f32 to vector<2x128xf32>
    %120 = arith.addf %119, %118 : vector<2x128xf32>
    %121 = arith.divf %119, %120 : vector<2x128xf32>
    %122 = vector.extract_strided_slice %111 {offsets = [0, 128], sizes = [2, 128], strides = [1, 1]} : vector<2x384xf32> to vector<2x128xf32>
    %123 = vector.extract_strided_slice %113 {offsets = [0, 128], sizes = [2, 128], strides = [1, 1]} : vector<2x384xf32> to vector<2x128xf32>
    %124 = arith.addf %122, %123 : vector<2x128xf32>
    %125 = arith.negf %124 : vector<2x128xf32>
    %126 = math.exp %125 : vector<2x128xf32>
    %cst_34 = arith.constant 1.000000e+00 : f32
    %127 = vector.broadcast %cst_34 : f32 to vector<2x128xf32>
    %128 = arith.addf %127, %126 : vector<2x128xf32>
    %129 = arith.divf %127, %128 : vector<2x128xf32>
    %130 = vector.extract_strided_slice %111 {offsets = [0, 256], sizes = [2, 128], strides = [1, 1]} : vector<2x384xf32> to vector<2x128xf32>
    %131 = vector.extract_strided_slice %113 {offsets = [0, 256], sizes = [2, 128], strides = [1, 1]} : vector<2x384xf32> to vector<2x128xf32>
    %132 = arith.mulf %121, %131 : vector<2x128xf32>
    %133 = arith.addf %130, %132 : vector<2x128xf32>
    %134 = math.tanh %133 : vector<2x128xf32>
    %cst_35 = arith.constant 1.000000e+00 : f32
    %135 = vector.broadcast %cst_35 : f32 to vector<2x128xf32>
    %136 = arith.subf %135, %129 : vector<2x128xf32>
    %137 = arith.mulf %136, %134 : vector<2x128xf32>
    %138 = arith.mulf %129, %107 : vector<2x128xf32>
    %139 = arith.addf %137, %138 : vector<2x128xf32>
    %c0_36 = arith.constant 0 : index
    %c3 = arith.constant 3 : index
    %c0_37 = arith.constant 0 : index
    %140 = vector.load %arg10[%c0_36, %c3, %c0_37] : memref<2x8x128xf32, #tpu.memory_space<vmem>>, vector<2x1x128xf32>
    %141 = vector.shape_cast %140 : vector<2x1x128xf32> to vector<2x128xf32>
    %142 = vector.shape_cast %139 : vector<2x128xf32> to vector<2x1x128xf32>
    tpu.vector_store %arg10[%c0_36, %c3, %c0_37], %142 {strides = array<i32>} : memref<2x8x128xf32, #tpu.memory_space<vmem>>, vector<2x1x128xf32>,
    %143 = vector.extract_strided_slice %9 {offsets = [8, 0], sizes = [2, 384], strides = [1, 1]} : vector<16x384xf32> to vector<2x384xf32>
    %cst_38 = arith.constant dense<0.000000e+00> : vector<2x384xf32>
    %144 = tpu.matmul %139, %10, %cst_38 {dimension_numbers = #tpu.dot_dimension_numbers<[1], [0], [0], [1], [0, 0, 1, 1], [], []>} : vector<2x128xf32>, vector<128x384xf32>, vector<2x384xf32> -> vector<2x384xf32>
    %145 = arith.addf %144, %13 : vector<2x384xf32>
    %146 = vector.extract_strided_slice %143 {offsets = [0, 0], sizes = [2, 128], strides = [1, 1]} : vector<2x384xf32> to vector<2x128xf32>
    %147 = vector.extract_strided_slice %145 {offsets = [0, 0], sizes = [2, 128], strides = [1, 1]} : vector<2x384xf32> to vector<2x128xf32>
    %148 = arith.addf %146, %147 : vector<2x128xf32>
    %149 = arith.negf %148 : vector<2x128xf32>
    %150 = math.exp %149 : vector<2x128xf32>
    %cst_39 = arith.constant 1.000000e+00 : f32
    %151 = vector.broadcast %cst_39 : f32 to vector<2x128xf32>
    %152 = arith.addf %151, %150 : vector<2x128xf32>
    %153 = arith.divf %151, %152 : vector<2x128xf32>
    %154 = vector.extract_strided_slice %143 {offsets = [0, 128], sizes = [2, 128], strides = [1, 1]} : vector<2x384xf32> to vector<2x128xf32>
    %155 = vector.extract_strided_slice %145 {offsets = [0, 128], sizes = [2, 128], strides = [1, 1]} : vector<2x384xf32> to vector<2x128xf32>
    %156 = arith.addf %154, %155 : vector<2x128xf32>
    %157 = arith.negf %156 : vector<2x128xf32>
    %158 = math.exp %157 : vector<2x128xf32>
    %cst_40 = arith.constant 1.000000e+00 : f32
    %159 = vector.broadcast %cst_40 : f32 to vector<2x128xf32>
    %160 = arith.addf %159, %158 : vector<2x128xf32>
    %161 = arith.divf %159, %160 : vector<2x128xf32>
    %162 = vector.extract_strided_slice %143 {offsets = [0, 256], sizes = [2, 128], strides = [1, 1]} : vector<2x384xf32> to vector<2x128xf32>
    %163 = vector.extract_strided_slice %145 {offsets = [0, 256], sizes = [2, 128], strides = [1, 1]} : vector<2x384xf32> to vector<2x128xf32>
    %164 = arith.mulf %153, %163 : vector<2x128xf32>
    %165 = arith.addf %162, %164 : vector<2x128xf32>
    %166 = math.tanh %165 : vector<2x128xf32>
    %cst_41 = arith.constant 1.000000e+00 : f32
    %167 = vector.broadcast %cst_41 : f32 to vector<2x128xf32>
    %168 = arith.subf %167, %161 : vector<2x128xf32>
    %169 = arith.mulf %168, %166 : vector<2x128xf32>
    %170 = arith.mulf %161, %139 : vector<2x128xf32>
    %171 = arith.addf %169, %170 : vector<2x128xf32>
    %c0_42 = arith.constant 0 : index
    %c4 = arith.constant 4 : index
    %c0_43 = arith.constant 0 : index
    %172 = vector.load %arg10[%c0_42, %c4, %c0_43] : memref<2x8x128xf32, #tpu.memory_space<vmem>>, vector<2x1x128xf32>
    %173 = vector.shape_cast %172 : vector<2x1x128xf32> to vector<2x128xf32>
    %174 = vector.shape_cast %171 : vector<2x128xf32> to vector<2x1x128xf32>
    tpu.vector_store %arg10[%c0_42, %c4, %c0_43], %174 {strides = array<i32>} : memref<2x8x128xf32, #tpu.memory_space<vmem>>, vector<2x1x128xf32>,
    %175 = vector.extract_strided_slice %9 {offsets = [10, 0], sizes = [2, 384], strides = [1, 1]} : vector<16x384xf32> to vector<2x384xf32>
    %cst_44 = arith.constant dense<0.000000e+00> : vector<2x384xf32>
    %176 = tpu.matmul %171, %10, %cst_44 {dimension_numbers = #tpu.dot_dimension_numbers<[1], [0], [0], [1], [0, 0, 1, 1], [], []>} : vector<2x128xf32>, vector<128x384xf32>, vector<2x384xf32> -> vector<2x384xf32>
    %177 = arith.addf %176, %13 : vector<2x384xf32>
    %178 = vector.extract_strided_slice %175 {offsets = [0, 0], sizes = [2, 128], strides = [1, 1]} : vector<2x384xf32> to vector<2x128xf32>
    %179 = vector.extract_strided_slice %177 {offsets = [0, 0], sizes = [2, 128], strides = [1, 1]} : vector<2x384xf32> to vector<2x128xf32>
    %180 = arith.addf %178, %179 : vector<2x128xf32>
    %181 = arith.negf %180 : vector<2x128xf32>
    %182 = math.exp %181 : vector<2x128xf32>
    %cst_45 = arith.constant 1.000000e+00 : f32
    %183 = vector.broadcast %cst_45 : f32 to vector<2x128xf32>
    %184 = arith.addf %183, %182 : vector<2x128xf32>
    %185 = arith.divf %183, %184 : vector<2x128xf32>
    %186 = vector.extract_strided_slice %175 {offsets = [0, 128], sizes = [2, 128], strides = [1, 1]} : vector<2x384xf32> to vector<2x128xf32>
    %187 = vector.extract_strided_slice %177 {offsets = [0, 128], sizes = [2, 128], strides = [1, 1]} : vector<2x384xf32> to vector<2x128xf32>
    %188 = arith.addf %186, %187 : vector<2x128xf32>
    %189 = arith.negf %188 : vector<2x128xf32>
    %190 = math.exp %189 : vector<2x128xf32>
    %cst_46 = arith.constant 1.000000e+00 : f32
    %191 = vector.broadcast %cst_46 : f32 to vector<2x128xf32>
    %192 = arith.addf %191, %190 : vector<2x128xf32>
    %193 = arith.divf %191, %192 : vector<2x128xf32>
    %194 = vector.extract_strided_slice %175 {offsets = [0, 256], sizes = [2, 128], strides = [1, 1]} : vector<2x384xf32> to vector<2x128xf32>
    %195 = vector.extract_strided_slice %177 {offsets = [0, 256], sizes = [2, 128], strides = [1, 1]} : vector<2x384xf32> to vector<2x128xf32>
    %196 = arith.mulf %185, %195 : vector<2x128xf32>
    %197 = arith.addf %194, %196 : vector<2x128xf32>
    %198 = math.tanh %197 : vector<2x128xf32>
    %cst_47 = arith.constant 1.000000e+00 : f32
    %199 = vector.broadcast %cst_47 : f32 to vector<2x128xf32>
    %200 = arith.subf %199, %193 : vector<2x128xf32>
    %201 = arith.mulf %200, %198 : vector<2x128xf32>
    %202 = arith.mulf %193, %171 : vector<2x128xf32>
    %203 = arith.addf %201, %202 : vector<2x128xf32>
    %c0_48 = arith.constant 0 : index
    %c5 = arith.constant 5 : index
    %c0_49 = arith.constant 0 : index
    %204 = vector.load %arg10[%c0_48, %c5, %c0_49] : memref<2x8x128xf32, #tpu.memory_space<vmem>>, vector<2x1x128xf32>
    %205 = vector.shape_cast %204 : vector<2x1x128xf32> to vector<2x128xf32>
    %206 = vector.shape_cast %203 : vector<2x128xf32> to vector<2x1x128xf32>
    tpu.vector_store %arg10[%c0_48, %c5, %c0_49], %206 {strides = array<i32>} : memref<2x8x128xf32, #tpu.memory_space<vmem>>, vector<2x1x128xf32>,
    %207 = vector.extract_strided_slice %9 {offsets = [12, 0], sizes = [2, 384], strides = [1, 1]} : vector<16x384xf32> to vector<2x384xf32>
    %cst_50 = arith.constant dense<0.000000e+00> : vector<2x384xf32>
    %208 = tpu.matmul %203, %10, %cst_50 {dimension_numbers = #tpu.dot_dimension_numbers<[1], [0], [0], [1], [0, 0, 1, 1], [], []>} : vector<2x128xf32>, vector<128x384xf32>, vector<2x384xf32> -> vector<2x384xf32>
    %209 = arith.addf %208, %13 : vector<2x384xf32>
    %210 = vector.extract_strided_slice %207 {offsets = [0, 0], sizes = [2, 128], strides = [1, 1]} : vector<2x384xf32> to vector<2x128xf32>
    %211 = vector.extract_strided_slice %209 {offsets = [0, 0], sizes = [2, 128], strides = [1, 1]} : vector<2x384xf32> to vector<2x128xf32>
    %212 = arith.addf %210, %211 : vector<2x128xf32>
    %213 = arith.negf %212 : vector<2x128xf32>
    %214 = math.exp %213 : vector<2x128xf32>
    %cst_51 = arith.constant 1.000000e+00 : f32
    %215 = vector.broadcast %cst_51 : f32 to vector<2x128xf32>
    %216 = arith.addf %215, %214 : vector<2x128xf32>
    %217 = arith.divf %215, %216 : vector<2x128xf32>
    %218 = vector.extract_strided_slice %207 {offsets = [0, 128], sizes = [2, 128], strides = [1, 1]} : vector<2x384xf32> to vector<2x128xf32>
    %219 = vector.extract_strided_slice %209 {offsets = [0, 128], sizes = [2, 128], strides = [1, 1]} : vector<2x384xf32> to vector<2x128xf32>
    %220 = arith.addf %218, %219 : vector<2x128xf32>
    %221 = arith.negf %220 : vector<2x128xf32>
    %222 = math.exp %221 : vector<2x128xf32>
    %cst_52 = arith.constant 1.000000e+00 : f32
    %223 = vector.broadcast %cst_52 : f32 to vector<2x128xf32>
    %224 = arith.addf %223, %222 : vector<2x128xf32>
    %225 = arith.divf %223, %224 : vector<2x128xf32>
    %226 = vector.extract_strided_slice %207 {offsets = [0, 256], sizes = [2, 128], strides = [1, 1]} : vector<2x384xf32> to vector<2x128xf32>
    %227 = vector.extract_strided_slice %209 {offsets = [0, 256], sizes = [2, 128], strides = [1, 1]} : vector<2x384xf32> to vector<2x128xf32>
    %228 = arith.mulf %217, %227 : vector<2x128xf32>
    %229 = arith.addf %226, %228 : vector<2x128xf32>
    %230 = math.tanh %229 : vector<2x128xf32>
    %cst_53 = arith.constant 1.000000e+00 : f32
    %231 = vector.broadcast %cst_53 : f32 to vector<2x128xf32>
    %232 = arith.subf %231, %225 : vector<2x128xf32>
    %233 = arith.mulf %232, %230 : vector<2x128xf32>
    %234 = arith.mulf %225, %203 : vector<2x128xf32>
    %235 = arith.addf %233, %234 : vector<2x128xf32>
    %c0_54 = arith.constant 0 : index
    %c6 = arith.constant 6 : index
    %c0_55 = arith.constant 0 : index
    %236 = vector.load %arg10[%c0_54, %c6, %c0_55] : memref<2x8x128xf32, #tpu.memory_space<vmem>>, vector<2x1x128xf32>
    %237 = vector.shape_cast %236 : vector<2x1x128xf32> to vector<2x128xf32>
    %238 = vector.shape_cast %235 : vector<2x128xf32> to vector<2x1x128xf32>
    tpu.vector_store %arg10[%c0_54, %c6, %c0_55], %238 {strides = array<i32>} : memref<2x8x128xf32, #tpu.memory_space<vmem>>, vector<2x1x128xf32>,
    %239 = vector.extract_strided_slice %9 {offsets = [14, 0], sizes = [2, 384], strides = [1, 1]} : vector<16x384xf32> to vector<2x384xf32>
    %cst_56 = arith.constant dense<0.000000e+00> : vector<2x384xf32>
    %240 = tpu.matmul %235, %10, %cst_56 {dimension_numbers = #tpu.dot_dimension_numbers<[1], [0], [0], [1], [0, 0, 1, 1], [], []>} : vector<2x128xf32>, vector<128x384xf32>, vector<2x384xf32> -> vector<2x384xf32>
    %241 = arith.addf %240, %13 : vector<2x384xf32>
    %242 = vector.extract_strided_slice %239 {offsets = [0, 0], sizes = [2, 128], strides = [1, 1]} : vector<2x384xf32> to vector<2x128xf32>
    %243 = vector.extract_strided_slice %241 {offsets = [0, 0], sizes = [2, 128], strides = [1, 1]} : vector<2x384xf32> to vector<2x128xf32>
    %244 = arith.addf %242, %243 : vector<2x128xf32>
    %245 = arith.negf %244 : vector<2x128xf32>
    %246 = math.exp %245 : vector<2x128xf32>
    %cst_57 = arith.constant 1.000000e+00 : f32
    %247 = vector.broadcast %cst_57 : f32 to vector<2x128xf32>
    %248 = arith.addf %247, %246 : vector<2x128xf32>
    %249 = arith.divf %247, %248 : vector<2x128xf32>
    %250 = vector.extract_strided_slice %239 {offsets = [0, 128], sizes = [2, 128], strides = [1, 1]} : vector<2x384xf32> to vector<2x128xf32>
    %251 = vector.extract_strided_slice %241 {offsets = [0, 128], sizes = [2, 128], strides = [1, 1]} : vector<2x384xf32> to vector<2x128xf32>
    %252 = arith.addf %250, %251 : vector<2x128xf32>
    %253 = arith.negf %252 : vector<2x128xf32>
    %254 = math.exp %253 : vector<2x128xf32>
    %cst_58 = arith.constant 1.000000e+00 : f32
    %255 = vector.broadcast %cst_58 : f32 to vector<2x128xf32>
    %256 = arith.addf %255, %254 : vector<2x128xf32>
    %257 = arith.divf %255, %256 : vector<2x128xf32>
    %258 = vector.extract_strided_slice %239 {offsets = [0, 256], sizes = [2, 128], strides = [1, 1]} : vector<2x384xf32> to vector<2x128xf32>
    %259 = vector.extract_strided_slice %241 {offsets = [0, 256], sizes = [2, 128], strides = [1, 1]} : vector<2x384xf32> to vector<2x128xf32>
    %260 = arith.mulf %249, %259 : vector<2x128xf32>
    %261 = arith.addf %258, %260 : vector<2x128xf32>
    %262 = math.tanh %261 : vector<2x128xf32>
    %cst_59 = arith.constant 1.000000e+00 : f32
    %263 = vector.broadcast %cst_59 : f32 to vector<2x128xf32>
    %264 = arith.subf %263, %257 : vector<2x128xf32>
    %265 = arith.mulf %264, %262 : vector<2x128xf32>
    %266 = arith.mulf %257, %235 : vector<2x128xf32>
    %267 = arith.addf %265, %266 : vector<2x128xf32>
    %c0_60 = arith.constant 0 : index
    %c7 = arith.constant 7 : index
    %c0_61 = arith.constant 0 : index
    %268 = vector.load %arg10[%c0_60, %c7, %c0_61] : memref<2x8x128xf32, #tpu.memory_space<vmem>>, vector<2x1x128xf32>
    %269 = vector.shape_cast %268 : vector<2x1x128xf32> to vector<2x128xf32>
    %270 = vector.shape_cast %267 : vector<2x128xf32> to vector<2x1x128xf32>
    tpu.vector_store %arg10[%c0_60, %c7, %c0_61], %270 {strides = array<i32>} : memref<2x8x128xf32, #tpu.memory_space<vmem>>, vector<2x1x128xf32>,
    %c0_62 = arith.constant 0 : index
    %c0_63 = arith.constant 0 : index
    %271 = vector.load %arg12[%c0_62, %c0_63] : memref<2x128xf32, #tpu.memory_space<vmem>>, vector<2x128xf32>
    tpu.vector_store %arg12[%c0_62, %c0_63], %267 {strides = array<i32>} : memref<2x128xf32, #tpu.memory_space<vmem>>, vector<2x128xf32>,
    %c0_i32_64 = arith.constant 0 : i32
    %272 = arith.cmpi eq, %arg1, %c0_i32_64 : i32
    %273 = arith.extui %272 : i1 to i32
    %c0_i32_65 = arith.constant 0 : i32
    %274 = arith.cmpi ne, %273, %c0_i32_65 : i32
    scf.if %274 {
      %c0_66 = arith.constant 0 : index
      %c0_67 = arith.constant 0 : index
      %275 = vector.load %arg11[%c0_66, %c0_67] : memref<2x128xf32, #tpu.memory_space<vmem>>, vector<2x128xf32>
      tpu.vector_store %arg11[%c0_66, %c0_67], %267 {strides = array<i32>} : memref<2x128xf32, #tpu.memory_space<vmem>>, vector<2x128xf32>,
    } else {
    }
    return
  }
  func.func @transform_0(%arg0: i32, %arg1: i32) -> (i32, i32) {
    %c0_i32 = arith.constant 0 : i32
    %c0_i32_0 = arith.constant 0 : i32
    return %arg0, %c0_i32 : i32, i32
  }
  func.func @transform_1(%arg0: i32, %arg1: i32) -> (i32, i32) {
    %c0_i32 = arith.constant 0 : i32
    %c0_i32_0 = arith.constant 0 : i32
    %c0_i32_1 = arith.constant 0 : i32
    return %c0_i32, %c0_i32_0 : i32, i32
  }
  func.func @transform_2(%arg0: i32, %arg1: i32) -> (i32, i32) {
    %c0_i32 = arith.constant 0 : i32
    %c0_i32_0 = arith.constant 0 : i32
    %c0_i32_1 = arith.constant 0 : i32
    return %c0_i32, %c0_i32_0 : i32, i32
  }
  func.func @transform_3(%arg0: i32, %arg1: i32) -> (i32, i32, i32) {
    %c0_i32 = arith.constant 0 : i32
    %c0_i32_0 = arith.constant 0 : i32
    return %arg0, %arg1, %c0_i32 : i32, i32, i32
  }
  func.func @transform_4(%arg0: i32, %arg1: i32) -> (i32, i32) {
    %c0_i32 = arith.constant 0 : i32
    %c0_i32_0 = arith.constant 0 : i32
    %c0_i32_1 = arith.constant 0 : i32
    return %c0_i32, %c0_i32_0 : i32, i32
  }
  func.func @transform_5(%arg0: i32, %arg1: i32) -> (i32, i32) {
    %c0_i32 = arith.constant 0 : i32
    %c0_i32_0 = arith.constant 0 : i32
    %c0_i32_1 = arith.constant 0 : i32
    return %c0_i32, %c0_i32_0 : i32, i32
  }
  func.func @transform_6(%arg0: i32, %arg1: i32) -> (i32, i32) {
    %c0_i32 = arith.constant 0 : i32
    %c0_i32_0 = arith.constant 0 : i32
    %c0_i32_1 = arith.constant 0 : i32
    return %c0_i32, %c0_i32_0 : i32, i32
  }
  func.func @transform_7(%arg0: i32, %arg1: i32) -> (i32, i32) {
    %c0_i32 = arith.constant 0 : i32
    %c0_i32_0 = arith.constant 0 : i32
    %c0_i32_1 = arith.constant 0 : i32
    return %c0_i32, %c0_i32_0 : i32, i32
  }
  func.func @transform_8(%arg0: i32, %arg1: i32) -> (i32, i32, i32) {
    %c0_i32 = arith.constant 0 : i32
    %c0_i32_0 = arith.constant 0 : i32
    return %arg0, %arg1, %c0_i32 : i32, i32, i32
  }
  func.func @transform_9(%arg0: i32, %arg1: i32) -> (i32, i32) {
    %c0_i32 = arith.constant 0 : i32
    %c0_i32_0 = arith.constant 0 : i32
    return %arg0, %c0_i32 : i32, i32
  }
}

</mosaic_0001>

<bundles_post_ra>
// kernel: tpu_custom_call.1
= control target key start
LH: loop header
LB: loop body
LE: loop exit
PB: predicated region body
PF: predicated region fallthrough
CT: control target
= control target key end

     0   :  { %15 = vsyncpa [#allocation4], 0  ;;  %s3739_s0 = inlined_call_operand.hbm [shape: f32[2,7], index: 0, kind: input, shape index: {}]   ;;  %s3740_s1 = inlined_call_operand.vmem [shape: f32[7,128], index: 1, kind: input, shape index: {}]   ;;  %s3741_s2 = inlined_call_operand.vmem [shape: f32[1,128], index: 2, kind: input, shape index: {}]   ;;  %s3742_s3 = inlined_call_operand.vmem [shape: f32[1,16,1], index: 3, kind: input, shape index: {}]   ;;  %s3743_s4 = inlined_call_operand.vmem [shape: f32[1,384], index: 4, kind: input, shape index: {}]   ;;  %s3744_s5 = inlined_call_operand.hbm [shape: f32[128,384], index: 5, kind: input, shape index: {}]   ;;  %s3745_s6 = inlined_call_operand.vmem [shape: f32[1,384], index: 6, kind: input, shape index: {}]   ;;  %s3746_s7 = inlined_call_operand.vmem [shape: f32[1,384], index: 7, kind: input, shape index: {}]   ;;  %s3747_s8 = inlined_call_operand.hbm [shape: f32[2,8,128], index: 8, kind: output, shape index: {0}]   ;;  %s3748_s9 = inlined_call_operand.hbm [shape: f32[2,128], index: 9, kind: output, shape index: {1}]  }
   0x1   :  { %16 = vsyncpa [#allocation7], 0 }
   0x2   :  { %17 = vsyncpa [#allocation5], 0 }
   0x3   :  { %18 = vsyncpa [#allocation10], 0  ;;  %s2745_s30 = smov [#allocation3]   ;;  %s2746_s11 = smov [#allocation6]  }
   0x4   :  { %s25_s10 = sshll.u32 %s2745_s30, 4  ;;  %s42_s12 = sshll.u32 %s2746_s11, 4  ;;  %s26_s10 = int_to_ptr.vmem [resolvable:$true] %s25_s10  ;;  %s43_s12 = int_to_ptr.vmem [resolvable:$true] %s42_s12 }
   0x5   :  { %s2665_s13 = scalar_lea.vmem %s26_s10, 32  ;;  %p2670_p1 = scmp.lt.s32.totalorder %s26_s10, %s26_s10 }
   0x6   :  { %p2666_p0 = scmp.ne.s32.totalorder %s26_s10, %s2665_s13  ;;  %p2671_p2 = scmp.lt.s32.totalorder %s2665_s13, %s2665_s13 }
   0x8   :  { %p2672_p3 = por %p2671_p2, %p2670_p1 }
   0xa   :  { %p2673_p4 = pnand %p2672_p3, %p2666_p0 }
   0xc   :  { %2676 = shalt.err (!%p2673_p4)
}
   0xd   :  { %28 = dma.hbm_to_vmem [thread:$0]  %s3739_s0, 32, %s26_s10, [#allocation4]  }
   0xe   :  { %s2685_s16 = scalar_lea.vmem %s43_s12, 6144  ;;  %p2690_p6 = scmp.lt.s32.totalorder %s43_s12, %s43_s12 }
   0xf   :  { %p2686_p5 = scmp.ne.s32.totalorder %s43_s12, %s2685_s16  ;;  %p2691_p7 = scmp.lt.s32.totalorder %s2685_s16, %s2685_s16 }
  0x11   :  { %p2692_p8 = por %p2691_p7, %p2690_p6 }
  0x13   :  { %p2693_p9 = pnand %p2692_p8, %p2686_p5 }
  0x15   :  { %2696 = shalt.err (!%p2693_p9)
}
  0x16   :  { %s2747_s17 = smov 384   ;;  %s2748_s18 = smov 24  }
  0x17   :  { %48 = dma.hbm_to_vmem [thread:$0]  %s3744_s5, 6144, %s43_s12, [#allocation7], %s2747_s17, %s2747_s17, %s2748_s18  }
  0x18   :  { %2737 = dma.done.wait [#allocation4], 32  }
  0x19   :  { %2738 = vsyncadd [#allocation4], 4294967264 }
  0x1a   :  { %2739 = dma.done.wait [#allocation7], 6144  }
  0x1b   :  { %2740 = vsyncadd [#allocation7], 4294961152  ;;  %v3759_v0 = vmov 0.0   ;;  %vm2750_vm0 = vmmov 0   ;;  %v156_v1 = vlaneseq  ;;  %vm76_vm1 = vcmask 1046528   ;;  %v151_v12 = vld [vmem:[%s3742_s3] sm:$0xff] }
  0x1c   :  { %2228 = vmatprep.subr.mxu0 %v3759_v0  ;;  %2230 = vmatprep.mubr.msk.f32.mxu0 %vm2750_vm0, %v3759_v0  ;;  %vm72_vm2 = vcmask 56320   ;;  %vm191_vm3 = vcmask 1040384   ;;  %v64_v6 = vld [vmem:[%s3740_s1] sm:$0x7f]  ;;  %vm184_vm4 = vcmask 7168   ;;  %v2839_v13 = vld [vmem:[#allocation6 + $0x170] sm:$0xff] }
  0x1d   :  { %262 = vmatprep.mubr.f32.mxu1 %v3759_v0  ;;  %v2816_v2 = vshrl.u32 %v156_v1, 7  ;;  %v63_v7 = vld [vmem:[#allocation3] sm:$0x3]  ;;  %2229 = vmatpush3.msk.msra.mxu0 %vm76_vm1, %v64_v6  ;;  %3791 = vst [vmem:[#allocation15_spill] sm:$0xff] %v2839_v13  ;;  %v2844_v14 = vld [vmem:[%s3742_s3 + $0x8] sm:$0xff]  ;;  %v2856_v18 = vld [vmem:[#allocation6 + $0x150] sm:$0xff] }
  0x1e   :  { %v153_v8 = vld [vmem:[%s3743_s4] sm:$0x7]  ;;  %2231 = vmatmul.mubr.msk.f32.vlgmr.msra.gmra.mxu0 %vm72_vm2, %v63_v7  ;;  %v2846_v15 = vld [vmem:[#allocation6 + $0x168] sm:$0xff]  ;;  %v2861_v19 = vld [vmem:[#allocation6 + $0x160] sm:$0xff] }
  0x1f   :  { %v2819_v3 = vsub.s32 1, %v2816_v2  ;;  %v2822_v4 = vsub.s32 2, %v2816_v2  ;;  %v2825_v5 = vsub.s32 0, %v2816_v2  ;;  %2235 = vmatprep.mubr.msk.f32.mxu0 %vm184_vm4, %v151_v12  ;;  %v2850_v16 = vld [vmem:[#allocation6 + $0x178] sm:$0xff]  ;;  %v2863_v20 = vld [vmem:[#allocation6 + $0x140] sm:$0xff]  ;;  %v2871_v22 = vld [vmem:[#allocation6 + $0x148] sm:$0xff] }
  0x20   :  { %v2852_v17 = vld [vmem:[#allocation6 + $0x158] sm:$0xff]  ;;  %v2873_v23 = vld [vmem:[#allocation6 + $0x128] sm:$0xff]  ;;  %v2877_v24 = vld [vmem:[#allocation6 + $0x120] sm:$0xff] }
  0x21   :  { %v179_v9 = vrot.slane %v153_v8, %v2819_v3  ;;  %v183_v10 = vrot.slane %v153_v8, %v2822_v4  ;;  %v175_v11 = vrot.slane %v153_v8, %v2825_v5  ;;  %v2867_v21 = vld [vmem:[#allocation6 + $0x138] sm:$0xff]  ;;  %v2881_v25 = vld [vmem:[#allocation6 + $0x130] sm:$0xff]  ;;  %v2887_v27 = vld [vmem:[#allocation6 + $0x108] sm:$0xff] }
  0x22   :  { %v2883_v26 = vld [vmem:[#allocation6 + $0x110] sm:$0xff]  ;;  %v2891_v28 = vld [vmem:[#allocation6 + $0x118] sm:$0xff]  ;;  %v2901_v31 = vld [vmem:[#allocation6 + $0x100] sm:$0xff] }
  0x23   :  { %2056 = vmatprep.subr.msk.mxu1 %vm191_vm3, %v179_v9  ;;  %2233 = vmatprep.subr.msk.mxu0 %vm191_vm3, %v183_v10  ;;  %v2893_v29 = vld [vmem:[#allocation6 + $0xf8] sm:$0xff]  ;;  %v2897_v30 = vld [vmem:[#allocation6 + $0xf0] sm:$0xff]  ;;  %v2903_v32 = vld [vmem:[#allocation6 + $0xe0] sm:$0xff] }
  0x24   :  { %2057 = vmatpush1.msk.msra.mxu1 %vm191_vm3, %v175_v11  ;;  %2234 = vmatpush3.msk.msra.mxu0 %vm191_vm3, %v183_v10  ;;  %v2907_v33 = vld [vmem:[#allocation6 + $0xd8] sm:$0xff]  ;;  %v2911_v34 = vld [vmem:[#allocation6 + $0xe8] sm:$0xff]  ;;  %v2917_v36 = vld [vmem:[#allocation6 + $0xc0] sm:$0xff] }
  0x25   :  { %2058 = vmatmul.mubr.msk.f32.vlgmr.msra.gmra.mxu1 %vm184_vm4, %v151_v12  ;;  %416 = vmatprep.subr.mxu1 %v2839_v13  ;;  %v2913_v35 = vld [vmem:[#allocation6 + $0xc8] sm:$0xff]  ;;  %v2921_v37 = vld [vmem:[#allocation6 + $0xd0] sm:$0xff]  ;;  %v2931_v40 = vld [vmem:[#allocation6 + $0xb8] sm:$0xff] }
  0x26   :  { %2238 = vmatprep.subr.mxu0 %v3759_v0  ;;  %2236 = vmatmul.mubr.msk.f32.vlgmr.msra.gmra.mxu0 %vm184_vm4, %v2844_v14  ;;  %v2923_v38 = vld [vmem:[#allocation6 + $0xb0] sm:$0xff]  ;;  %v2927_v39 = vld [vmem:[#allocation6 + $0xa8] sm:$0xff]  ;;  %v2933_v41 = vld [vmem:[#allocation6 + $0x98] sm:$0xff] }
  0x27   :  { %417 = vmatpush1.msra.mxu1 %v2846_v15  ;;  %2239 = vmatpush3.msra.mxu0 %v2850_v16  ;;  %v2937_v42 = vld [vmem:[#allocation6 + $0x90] sm:$0xff]  ;;  %v2941_v43 = vld [vmem:[#allocation6 + $0xa0] sm:$0xff]  ;;  %v2958_v45 = vld [vmem:[#allocation6 + $0x78] sm:$0xff] }
  0x28   :  { %418 = vmatprep.subr.mxu1 %v2852_v17  ;;  %2240 = vmatprep.subr.mxu0 %v3759_v0  ;;  %v2943_v44 = vld [vmem:[#allocation6 + $0x80] sm:$0xff]  ;;  %v2960_v46 = vld [vmem:[#allocation6 + $0x88] sm:$0xff]  ;;  %v2970_v49 = vld [vmem:[#allocation6 + $0x70] sm:$0xff] }
  0x29   :  { %419 = vmatpush1.msra.mxu1 %v2856_v18  ;;  %2241 = vmatpush3.msra.mxu0 %v2861_v19  ;;  %v2964_v47 = vld [vmem:[#allocation6 + $0x68] sm:$0xff]  ;;  %v2968_v48 = vld [vmem:[#allocation6 + $0x60] sm:$0xff]  ;;  %v2974_v50 = vld [vmem:[#allocation6 + $0x50] sm:$0xff] }
  0x2a   :  { %420 = vmatprep.subr.mxu1 %v2863_v20  ;;  %2242 = vmatprep.subr.mxu0 %v3759_v0  ;;  %v2978_v51 = vld [vmem:[#allocation6 + $0x48] sm:$0xff]  ;;  %v2980_v52 = vld [vmem:[#allocation6 + $0x58] sm:$0xff]  ;;  %v2986_v54 = vld [vmem:[#allocation6 + $0x30] sm:$0xff] }
  0x2b   :  { %421 = vmatpush1.msra.mxu1 %v2867_v21  ;;  %2243 = vmatpush3.msra.mxu0 %v2871_v22  ;;  %v2982_v53 = vld [vmem:[#allocation6 + $0x38] sm:$0xff]  ;;  %3792 = vst [vmem:[#allocation16_spill] sm:$0xff] %v2986_v54  ;;  %v2988_v55 = vld [vmem:[#allocation6 + $0x40] sm:$0xff]  ;;  %v2996_v58 = vld [vmem:[#allocation6 + $0x28] sm:$0xff] }
  0x2c   :  { %422 = vmatprep.subr.mxu1 %v2873_v23  ;;  %2244 = vmatprep.subr.mxu0 %v3759_v0  ;;  %3793 = vst [vmem:[#allocation17_spill] sm:$0xff] %v2988_v55  ;;  %v2990_v56 = vld [vmem:[#allocation6 + $0x20] sm:$0xff]  ;;  %v2994_v57 = vld [vmem:[#allocation6 + $0x18] sm:$0xff]  ;;  %3796 = vst [vmem:[#allocation20_spill] sm:$0xff] %v2996_v58 }
  0x2d   :  { %423 = vmatpush1.msra.mxu1 %v2877_v24  ;;  %2245 = vmatpush3.msra.mxu0 %v2881_v25  ;;  %3794 = vst [vmem:[#allocation18_spill] sm:$0xff] %v2990_v56  ;;  %3795 = vst [vmem:[#allocation19_spill] sm:$0xff] %v2994_v57  ;;  %v3000_v59 = vld [vmem:[#allocation6 + $0x8] sm:$0xff]  ;;  %v3004_v60 = vld [vmem:[#allocation6] sm:$0xff] }
  0x2e   :  { %424 = vmatprep.subr.mxu1 %v2883_v26  ;;  %2246 = vmatprep.subr.mxu0 %v3759_v0  ;;  %3797 = vst [vmem:[#allocation21_spill] sm:$0xff] %v3000_v59  ;;  %3798 = vst [vmem:[#allocation22_spill] sm:$0xff] %v3004_v60  ;;  %v3006_v61 = vld [vmem:[#allocation6 + $0x10] sm:$0xff]  ;;  %v2053_v62 = vld [vmem:[%s3741_s2] ss:$0 sm:$0xff] }
  0x2f   :  { %425 = vmatpush1.msra.mxu1 %v2887_v27  ;;  %2247 = vmatpush3.msra.mxu0 %v2891_v28  ;;  %3799 = vst [vmem:[#allocation23_spill] sm:$0xff] %v3006_v61  ;;  %v3022_v6 = vld [vmem:[%s3745_s6] sm:$0x7] }
  0x30   :  { %426 = vmatprep.subr.mxu1 %v2893_v29  ;;  %2248 = vmatprep.subr.mxu0 %v3759_v0  ;;  %v3026_v8 = vrot.slane %v3022_v6, %v2822_v4 }
  0x31   :  { %427 = vmatpush1.msra.mxu1 %v2897_v30  ;;  %2249 = vmatpush3.msra.mxu0 %v2901_v31 }
  0x32   :  { %428 = vmatprep.subr.mxu1 %v2903_v32  ;;  %2250 = vmatprep.subr.mxu0 %v3759_v0 }
  0x33   :  { %429 = vmatpush1.msra.mxu1 %v2907_v33  ;;  %2251 = vmatpush3.msra.mxu0 %v2911_v34 }
  0x34   :  { %430 = vmatprep.subr.mxu1 %v2913_v35  ;;  %2252 = vmatprep.subr.mxu0 %v3759_v0 }
  0x35   :  { %431 = vmatpush1.msra.mxu1 %v2917_v36  ;;  %2253 = vmatpush3.msra.mxu0 %v2921_v37 }
  0x36   :  { %432 = vmatprep.subr.mxu1 %v2923_v38  ;;  %2254 = vmatprep.subr.mxu0 %v3759_v0 }
  0x37   :  { %433 = vmatpush1.msra.mxu1 %v2927_v39  ;;  %2255 = vmatpush3.msra.mxu0 %v2931_v40 }
  0x38   :  { %434 = vmatprep.subr.mxu1 %v2933_v41  ;;  %2256 = vmatprep.subr.mxu0 %v3759_v0 }
  0x39   :  { %435 = vmatpush1.msra.mxu1 %v2937_v42  ;;  %2257 = vmatpush3.msra.mxu0 %v2941_v43 }
  0x3a   :  { %436 = vmatprep.subr.mxu1 %v2943_v44  ;;  %2258 = vmatprep.subr.mxu0 %v3759_v0 }
  0x3b   :  { %268 = vmatprep.mubr.f32.mxu1 %v3759_v0  ;;  %2270 = vmatprep.mubr.msk.f32.mxu0 %vm2750_vm0, %v3759_v0 }
  0x3c   :  { %2059 = vmatmul.mubr.msk.f32.gmra.mxu1 %vm184_vm4, %v2844_v14  ;;  %2259 = vmatpush3.msra.mxu0 %v2960_v46 }
  0x3d   :  { %480 = vmatprep.mubr.f32.mxu1 %v3759_v0  ;;  %437 = vmatpush1.msra.mxu1 %v2958_v45 }
  0x3e   :  { %438 = vmatprep.subr.mxu1 %v2964_v47  ;;  %2260 = vmatprep.subr.mxu0 %v3759_v0 }
  0x3f   :  { %439 = vmatpush1.msra.mxu1 %v2968_v48  ;;  %2261 = vmatpush3.msra.mxu0 %v2970_v49 }
  0x40   :  { %440 = vmatprep.subr.mxu1 %v2974_v50  ;;  %2262 = vmatprep.subr.mxu0 %v3759_v0 }
  0x41   :  { %441 = vmatpush1.msra.mxu1 %v2978_v51  ;;  %2263 = vmatpush3.msra.mxu0 %v2980_v52 }
  0x42   :  { %442 = vmatprep.subr.mxu1 %v2982_v53  ;;  %2264 = vmatprep.subr.mxu0 %v3759_v0 }
  0x43   :  { %443 = vmatpush1.msra.mxu1 %v2986_v54  ;;  %2265 = vmatpush3.msra.mxu0 %v2988_v55 }
  0x44   :  { %444 = vmatprep.subr.mxu1 %v2990_v56  ;;  %2266 = vmatprep.subr.mxu0 %v3759_v0 }
  0x45   :  { %445 = vmatpush1.msra.mxu1 %v2994_v57  ;;  %2267 = vmatpush3.msra.mxu0 %v2996_v58 }
  0x46   :  { %446 = vmatprep.subr.mxu1 %v3000_v59  ;;  %2268 = vmatprep.subr.mxu0 %v3759_v0 }
  0x47   :  { %447 = vmatpush1.msra.mxu1 %v3004_v60  ;;  %2269 = vmatpush3.msra.mxu0 %v3006_v61 }
  0x48   :  { %605 = vmatprep.subr.mxu1 %v2839_v13  ;;  %2273 = vmatprep.subr.mxu0 %v3759_v0 }
  0xde   :  { %v146_v63 = vpop.f32.mrf.mxu0 }
  0xdf   :  { %v147_v1 = vadd.f32 %v2053_v62, %v146_v63  ;;  %v159_v62 = vrot.slane %v3022_v6, %v2825_v5 }
  0xe0   :  { %v2232_v7 = vpop.f32.mrf.mxu0 }
  0xe1   :  { %150 = vst [vmem:[#allocation2] sm:$0x3] %v147_v1  ;;  %v398_v7 = vld [vmem:[%s3746_s7] sm:$0x7]  ;;  %s2752_s7 = smov [#allocation9]  }
  0xe2   :  { %s2039_s28 = sshll.u32 %s2752_s7, 4  ;;  %s2040_s28 = int_to_ptr.vmem [resolvable:$true] %s2039_s28 }
  0xe3   :  { %s2697_s29 = scalar_lea.vmem %s2040_s28, 32  ;;  %p2702_p11 = scmp.lt.s32.totalorder %s2040_s28, %s2040_s28 }
  0xe4   :  { %p2698_p10 = scmp.ne.s32.totalorder %s2040_s28, %s2697_s29  ;;  %p2703_p12 = scmp.lt.s32.totalorder %s2697_s29, %s2697_s29 }
  0xe5   :  { %v264_v12 = vpop.f32.mrf.mxu1 }
  0xe6   :  { %v2237_v9 = vpop.f32.mrf.mxu0  ;;  %p2704_p13 = por %p2703_p12, %p2702_p11 }
  0xe7   :  { %v3029_v10 = vadd.f32 %v2237_v9, %v3026_v8  ;;  %v266_v14 = vpop.f32.mrf.mxu1 }
  0xe8   :  { %v3031_v11 = vld [vmem:[#allocation2] sm:$0x3]  ;;  %v341_v9 = vpop.f32.mrf.mxu0  ;;  %p2705_p0 = pnand %p2704_p13, %p2698_p10 }
  0xe9   :  { %3800 = vst [vmem:[#allocation24_spill] sm:$0xff] %v3029_v10  ;;  %481 = vmatmul.mubr.f32.vlgmr.msra.gmra.mxu1 %v3031_v11  ;;  %2271 = vmatmul.mubr.f32.vlgmr.msra.gmra.mxu0 %v3031_v11 }
  0xea   :  { %606 = vmatpush1.msra.mxu1 %v2846_v15  ;;  %2274 = vmatpush3.msra.mxu0 %v2850_v16 }
  0xeb   :  { %607 = vmatprep.subr.mxu1 %v2852_v17  ;;  %2275 = vmatprep.subr.mxu0 %v3759_v0 }
  0xec   :  { %608 = vmatpush1.msra.mxu1 %v2856_v18  ;;  %2276 = vmatpush3.msra.mxu0 %v2861_v19 }
  0xed   :  { %609 = vmatprep.subr.mxu1 %v2863_v20  ;;  %2277 = vmatprep.subr.mxu0 %v3759_v0 }
  0xee   :  { %610 = vmatpush1.msra.mxu1 %v2867_v21  ;;  %2278 = vmatpush3.msra.mxu0 %v2871_v22 }
  0xef   :  { %611 = vmatprep.subr.mxu1 %v2873_v23  ;;  %2279 = vmatprep.subr.mxu0 %v3759_v0 }
  0xf0   :  { %612 = vmatpush1.msra.mxu1 %v2877_v24  ;;  %2280 = vmatpush3.msra.mxu0 %v2881_v25 }
  0xf1   :  { %613 = vmatprep.subr.mxu1 %v2883_v26  ;;  %2281 = vmatprep.subr.mxu0 %v3759_v0 }
  0xf2   :  { %614 = vmatpush1.msra.mxu1 %v2887_v27  ;;  %2282 = vmatpush3.msra.mxu0 %v2891_v28 }
  0xf3   :  { %615 = vmatprep.subr.mxu1 %v2893_v29  ;;  %2283 = vmatprep.subr.mxu0 %v3759_v0 }
  0xf4   :  { %616 = vmatpush1.msra.mxu1 %v2897_v30  ;;  %2284 = vmatpush3.msra.mxu0 %v2901_v31 }
  0xf5   :  { %617 = vmatprep.subr.mxu1 %v2903_v32  ;;  %2285 = vmatprep.subr.mxu0 %v3759_v0 }
  0xf6   :  { %618 = vmatpush1.msra.mxu1 %v2907_v33  ;;  %2286 = vmatpush3.msra.mxu0 %v2911_v34 }
  0xf7   :  { %619 = vmatprep.subr.mxu1 %v2913_v35  ;;  %2287 = vmatprep.subr.mxu0 %v3759_v0 }
  0xf8   :  { %620 = vmatpush1.msra.mxu1 %v2917_v36  ;;  %2288 = vmatpush3.msra.mxu0 %v2921_v37 }
  0xf9   :  { %621 = vmatprep.subr.mxu1 %v2923_v38  ;;  %2289 = vmatprep.subr.mxu0 %v3759_v0 }
  0xfa   :  { %622 = vmatpush1.msra.mxu1 %v2927_v39  ;;  %2290 = vmatpush3.msra.mxu0 %v2931_v40 }
  0xfb   :  { %623 = vmatprep.subr.mxu1 %v2933_v41  ;;  %2291 = vmatprep.subr.mxu0 %v3759_v0 }
  0xfc   :  { %v270_v63 = vpop.f32.mrf.mxu1  ;;  %624 = vmatpush1.msra.mxu1 %v2937_v42  ;;  %2292 = vmatpush3.msra.mxu0 %v2941_v43 }
  0xfd   :  { %v3067_v1 = vadd.f32 %v270_v63, %v159_v62  ;;  %625 = vmatprep.subr.mxu1 %v2943_v44  ;;  %2293 = vmatprep.subr.mxu0 %v3759_v0  ;;  %v3110_v63 = vrot.slane %v398_v7, %v2825_v5 }
  0xfe   :  { %626 = vmatpush1.msra.mxu1 %v2958_v45  ;;  %2294 = vmatpush3.msra.mxu0 %v2960_v46  ;;  %v3112_v10 = vpop.f32.mrf.mxu1 }
  0xff   :  { %3801 = vst [vmem:[#allocation25_spill] sm:$0xff] %v3067_v1  ;;  %627 = vmatprep.subr.mxu1 %v2964_v47  ;;  %2295 = vmatprep.subr.mxu0 %v3759_v0  ;;  %3802 = vst [vmem:[#allocation26_spill] sm:$0xff] %v3110_v63 }
 0x100   :  { %628 = vmatpush1.msra.mxu1 %v2968_v48  ;;  %2296 = vmatpush3.msra.mxu0 %v2970_v49  ;;  %3803 = vst [vmem:[#allocation27_spill] sm:$0xff] %v3112_v10 }
 0x101   :  { %629 = vmatprep.subr.mxu1 %v2974_v50  ;;  %2297 = vmatprep.subr.mxu0 %v3759_v0 }
 0x102   :  { %630 = vmatpush1.msra.mxu1 %v2978_v51  ;;  %2298 = vmatpush3.msra.mxu0 %v2980_v52 }
 0x103   :  { %631 = vmatprep.subr.mxu1 %v2982_v53  ;;  %2299 = vmatprep.subr.mxu0 %v3759_v0 }
 0x104   :  { %632 = vmatpush1.msra.mxu1 %v2986_v54  ;;  %2300 = vmatpush3.msra.mxu0 %v2988_v55 }
 0x105   :  { %633 = vmatprep.subr.mxu1 %v2990_v56  ;;  %2301 = vmatprep.subr.mxu0 %v3759_v0 }
 0x106   :  { %634 = vmatpush1.msra.mxu1 %v2994_v57  ;;  %2302 = vmatpush3.msra.mxu0 %v2996_v58  ;;  %v3122_v57 = vrot.slane %v3022_v6, %v2819_v3 }
 0x107   :  { %635 = vmatprep.subr.mxu1 %v3000_v59  ;;  %2303 = vmatprep.subr.mxu0 %v3759_v0  ;;  %v3117_v59 = vadd.f32 %v264_v12, %v159_v62 }
 0x108   :  { %636 = vmatpush1.msra.mxu1 %v3004_v60  ;;  %669 = vmatprep.mubr.f32.mxu1 %v3759_v0  ;;  %3805 = vst [vmem:[#allocation29_spill] sm:$0xff] %v3122_v57  ;;  %v3127_v55 = vadd.f32 %v266_v14, %v3122_v57 }
 0x109   :  { %2304 = vmatpush3.msra.mxu0 %v3006_v61  ;;  %2305 = vmatprep.mubr.msk.f32.mxu0 %vm2750_vm0, %v3759_v0  ;;  %v3115_v61 = vrot.slane %v398_v7, %v2819_v3  ;;  %v3131_v3 = vrot.slane %v398_v7, %v2822_v4 }
 0x10a   :  { %809 = vmatprep.subr.mxu1 %v2839_v13  ;;  %2308 = vmatprep.subr.mxu0 %v3759_v0 }
 0x10b   :  { %3804 = vst [vmem:[#allocation28_spill] sm:$0xff] %v3115_v61 }
 0x1a9   :  { %v482_v1 = vpop.f32.mrf.mxu1  ;;  %v553_v60 = vpop.f32.mrf.mxu0 }
 0x1aa   :  { %v483_v13 = vadd.f32 %v482_v1, %v3110_v63 }
 0x1ab   :  { %v484_v0 = vpop.f32.mrf.mxu1  ;;  %v2272_v58 = vpop.f32.mrf.mxu0 }
 0x1ac   :  { %v557_v5 = vadd.f32 %v483_v13, %v3117_v59  ;;  %v485_v10 = vadd.f32 %v484_v0, %v3115_v61  ;;  %v554_v13 = vadd.f32 %v553_v60, %v3131_v3  ;;  %v3135_v0 = vadd.f32 %v341_v9, %v3026_v8 }
 0x1ae   :  { %v2063_v56 = vmul.f32 -1.442695, %v557_v5  ;;  %v564_v12 = vadd.f32 %v485_v10, %v3127_v55  ;;  %v2751_v10 = vmov 1966171168  }
 0x1b0   :  { %2529 = vpow2.f32 %v2063_v56  ;;  %v2064_v62 = vmul.f32 -1.442695, %v564_v12  ;;  %v580_v12 = vunpack.c.l.s4 %v2751_v10  ;;  %v3814_v10 = vld [vmem:[#allocation15_spill] sm:$0xff] }
 0x1b2   :  { %2531 = vpow2.f32 %v2064_v62 }
 0x1bd   :  { %v2530_v1 = vpop.eup %2529 }
 0x1be   :  { %v561_v63 = vadd.f32 1.0, %v2530_v1 }
 0x1bf   :  { %v2532_v58 = vpop.eup %2531 }
 0x1c0   :  { %2533 = vrcp.f32 %v561_v63  ;;  %v568_v6 = vadd.f32 1.0, %v2532_v58  ;;  %v581_v63 = vunpack.c.0.s8 %v580_v12 }
 0x1c2   :  { %2535 = vrcp.f32 %v568_v6  ;;  %v3139_v4 = vsub.s32 %v581_v63, %v2816_v2  ;;  %v3806_v2 = vmov 0.0   ;;  %v3809_v6 = vld [vmem:[#allocation19_spill] sm:$0xff]  ;;  %v3815_v63 = vld [vmem:[#allocation26_spill] sm:$0xff] }
 0x1cd   :  { %v2534_v5 = vpop.eup %2533 }
 0x1ce   :  { %v571_v14 = vmul.f32 %v2534_v5, %v554_v13  ;;  %v3810_v13 = vld [vmem:[#allocation20_spill] sm:$0xff]  ;;  %v3811_v5 = vld [vmem:[#allocation21_spill] sm:$0xff] }
 0x1cf   :  { %v2536_v62 = vpop.eup %2535 }
 0x1d0   :  { %v572_v56 = vadd.f32 %v571_v14, %v3135_v0  ;;  %v574_v1 = vsub.f32 1.0, %v2536_v62  ;;  %v576_v60 = vmul.f32 %v2536_v62, %v3031_v11  ;;  %v3808_v11 = vld [vmem:[#allocation18_spill] sm:$0xff] }
 0x1d1   :  { %v3812_v14 = vld [vmem:[#allocation22_spill] sm:$0xff] }
 0x1d2   :  { %2537 = vtanh.f32 %v572_v56  ;;  %v3813_v56 = vld [vmem:[#allocation23_spill] sm:$0xff] }
 0x1df   :  { %v2538_v57 = vpop.eup %2537 }
 0x1e0   :  { %v575_v7 = vmul.f32 %v2538_v57, %v574_v1  ;;  %v3807_v57 = vld [vmem:[#allocation17_spill] sm:$0xff] }
 0x1e2   :  { %v3142_v58 = vadd.f32 %v576_v60, %v575_v7 }
 0x1e4   :  { %v585_v8 = vrot.slane %v3142_v58, %v3139_v4  ;;  %670 = vmatmul.mubr.f32.vlgmr.msra.gmra.mxu1 %v3142_v58  ;;  %2306 = vmatmul.mubr.f32.vlgmr.msra.gmra.mxu0 %v3142_v58 }
 0x1e5   :  { %810 = vmatpush1.msra.mxu1 %v2846_v15  ;;  %2309 = vmatpush3.msra.mxu0 %v2850_v16 }
 0x1e6   :  { %v586_v9 = vcombine.high %v585_v8, %v585_v8  ;;  %2065 = vst.sshfl [vmem:[#allocation8] sm:$0x1 pattern:$0x73625140] %v585_v8  ;;  %811 = vmatprep.subr.mxu1 %v2852_v17  ;;  %2310 = vmatprep.subr.mxu0 %v3806_v2 }
 0x1e7   :  { %812 = vmatpush1.msra.mxu1 %v2856_v18  ;;  %2311 = vmatpush3.msra.mxu0 %v2861_v19 }
 0x1e8   :  { %2066 = vst.sshfl [vmem:[#allocation8 + $0x8] sm:$0x1 pattern:$0x73625140] %v586_v9  ;;  %813 = vmatprep.subr.mxu1 %v2863_v20  ;;  %2312 = vmatprep.subr.mxu0 %v3806_v2 }
 0x1e9   :  { %814 = vmatpush1.msra.mxu1 %v2867_v21  ;;  %2313 = vmatpush3.msra.mxu0 %v2871_v22 }
 0x1ea   :  { %815 = vmatprep.subr.mxu1 %v2873_v23  ;;  %2314 = vmatprep.subr.mxu0 %v3806_v2 }
 0x1eb   :  { %816 = vmatpush1.msra.mxu1 %v2877_v24  ;;  %2315 = vmatpush3.msra.mxu0 %v2881_v25 }
 0x1ec   :  { %817 = vmatprep.subr.mxu1 %v2883_v26  ;;  %2316 = vmatprep.subr.mxu0 %v3806_v2 }
 0x1ed   :  { %818 = vmatpush1.msra.mxu1 %v2887_v27  ;;  %2317 = vmatpush3.msra.mxu0 %v2891_v28 }
 0x1ee   :  { %819 = vmatprep.subr.mxu1 %v2893_v29  ;;  %2318 = vmatprep.subr.mxu0 %v3806_v2 }
 0x1ef   :  { %820 = vmatpush1.msra.mxu1 %v2897_v30  ;;  %2319 = vmatpush3.msra.mxu0 %v2901_v31 }
 0x1f0   :  { %821 = vmatprep.subr.mxu1 %v2903_v32  ;;  %2320 = vmatprep.subr.mxu0 %v3806_v2 }
 0x1f1   :  { %822 = vmatpush1.msra.mxu1 %v2907_v33  ;;  %2321 = vmatpush3.msra.mxu0 %v2911_v34 }
 0x1f2   :  { %823 = vmatprep.subr.mxu1 %v2913_v35  ;;  %2322 = vmatprep.subr.mxu0 %v3806_v2 }
 0x1f3   :  { %824 = vmatpush1.msra.mxu1 %v2917_v36  ;;  %2323 = vmatpush3.msra.mxu0 %v2921_v37 }
 0x1f4   :  { %825 = vmatprep.subr.mxu1 %v2923_v38  ;;  %2324 = vmatprep.subr.mxu0 %v3806_v2 }
 0x1f5   :  { %826 = vmatpush1.msra.mxu1 %v2927_v39  ;;  %2325 = vmatpush3.msra.mxu0 %v2931_v40 }
 0x1f6   :  { %827 = vmatprep.subr.mxu1 %v2933_v41  ;;  %2326 = vmatprep.subr.mxu0 %v3806_v2 }
 0x1f7   :  { %828 = vmatpush1.msra.mxu1 %v2937_v42  ;;  %2327 = vmatpush3.msra.mxu0 %v2941_v43 }
 0x1f8   :  { %829 = vmatprep.subr.mxu1 %v2943_v44  ;;  %2328 = vmatprep.subr.mxu0 %v3806_v2 }
 0x1f9   :  { %830 = vmatpush1.msra.mxu1 %v2958_v45  ;;  %2329 = vmatpush3.msra.mxu0 %v2960_v46 }
 0x1fa   :  { %831 = vmatprep.subr.mxu1 %v2964_v47  ;;  %2330 = vmatprep.subr.mxu0 %v3806_v2 }
 0x1fb   :  { %832 = vmatpush1.msra.mxu1 %v2968_v48  ;;  %2331 = vmatpush3.msra.mxu0 %v2970_v49 }
 0x1fc   :  { %833 = vmatprep.subr.mxu1 %v2974_v50  ;;  %2332 = vmatprep.subr.mxu0 %v3806_v2 }
 0x1fd   :  { %834 = vmatpush1.msra.mxu1 %v2978_v51  ;;  %2333 = vmatpush3.msra.mxu0 %v2980_v52 }
 0x1fe   :  { %835 = vmatprep.subr.mxu1 %v2982_v53  ;;  %2334 = vmatprep.subr.mxu0 %v3806_v2 }
 0x1ff   :  { %836 = vmatpush1.msra.mxu1 %v2986_v54  ;;  %2335 = vmatpush3.msra.mxu0 %v3807_v57 }
 0x200   :  { %837 = vmatprep.subr.mxu1 %v3808_v11  ;;  %2336 = vmatprep.subr.mxu0 %v3806_v2 }
 0x201   :  { %838 = vmatpush1.msra.mxu1 %v3809_v6  ;;  %2337 = vmatpush3.msra.mxu0 %v3810_v13 }
 0x202   :  { %839 = vmatprep.subr.mxu1 %v3811_v5  ;;  %2338 = vmatprep.subr.mxu0 %v3806_v2 }
 0x203   :  { %840 = vmatpush1.msra.mxu1 %v3812_v14  ;;  %873 = vmatprep.mubr.f32.mxu1 %v3806_v2 }
 0x204   :  { %2339 = vmatpush3.msra.mxu0 %v3813_v56  ;;  %2340 = vmatprep.mubr.msk.f32.mxu0 %vm2750_vm0, %v3806_v2 }
 0x205   :  { %1012 = vmatprep.subr.mxu1 %v3814_v10  ;;  %2343 = vmatprep.subr.mxu0 %v3806_v2 }
 0x2a4   :  { %v671_v12 = vpop.f32.mrf.mxu1  ;;  %v742_v62 = vpop.f32.mrf.mxu0 }
 0x2a5   :  { %v672_v1 = vadd.f32 %v671_v12, %v3815_v63  ;;  %v743_v12 = vadd.f32 %v742_v62, %v3131_v3 }
 0x2a6   :  { %v673_v7 = vpop.f32.mrf.mxu1  ;;  %v2307_v60 = vpop.f32.mrf.mxu0 }
 0x2a7   :  { %v747_v8 = vrot.slane %v672_v1, 6  ;;  %v674_v9 = vadd.f32 %v673_v7, %v3115_v61  ;;  %v767_v60 = vrot.slane %v743_v12, 6  ;;  %v3816_v12 = vld [vmem:[#allocation16_spill] sm:$0xff] }
 0x2a9   :  { %v749_v14 = vadd.f32 %v747_v8, %v3117_v59  ;;  %v757_v56 = vrot.slane %v674_v9, 6 }
 0x2ab   :  { %v2067_v5 = vmul.f32 -1.442695, %v749_v14  ;;  %v759_v13 = vadd.f32 %v757_v56, %v3127_v55 }
 0x2ad   :  { %2539 = vpow2.f32 %v2067_v5  ;;  %v2068_v6 = vmul.f32 -1.442695, %v759_v13  ;;  %v774_v5 = vrot.slane %v3142_v58, 6 }
 0x2af   :  { %2541 = vpow2.f32 %v2068_v6 }
 0x2ba   :  { %v2540_v10 = vpop.eup %2539 }
 0x2bb   :  { %v753_v11 = vadd.f32 1.0, %v2540_v10 }
 0x2bc   :  { %v2542_v57 = vpop.eup %2541 }
 0x2bd   :  { %2543 = vrcp.f32 %v753_v11  ;;  %v763_v63 = vadd.f32 1.0, %v2542_v57 }
 0x2bf   :  { %2545 = vrcp.f32 %v763_v63 }
 0x2ca   :  { %v2544_v1 = vpop.eup %2543 }
 0x2cb   :  { %v769_v54 = vmul.f32 %v2544_v1, %v767_v60  ;;  %v3817_v60 = vld [vmem:[#allocation17_spill] sm:$0xff]  ;;  %v3818_v1 = vld [vmem:[#allocation18_spill] sm:$0xff] }
 0x2cc   :  { %v2546_v14 = vpop.eup %2545 }
 0x2cd   :  { %v770_v7 = vadd.f32 %v769_v54, %v3135_v0  ;;  %v772_v56 = vsub.f32 1.0, %v2546_v14  ;;  %v776_v8 = vmul.f32 %v2546_v14, %v774_v5  ;;  %v3820_v14 = vld [vmem:[#allocation20_spill] sm:$0xff]  ;;  %v3821_v5 = vld [vmem:[#allocation21_spill] sm:$0xff] }
 0x2cf   :  { %2547 = vtanh.f32 %v770_v7  ;;  %v3819_v7 = vld [vmem:[#allocation19_spill] sm:$0xff] }
 0x2dc   :  { %v2548_v13 = vpop.eup %2547 }
 0x2dd   :  { %v773_v6 = vmul.f32 %v2548_v13, %v772_v56  ;;  %v3822_v56 = vld [vmem:[#allocation22_spill] sm:$0xff]  ;;  %v3823_v13 = vld [vmem:[#allocation23_spill] sm:$0xff] }
 0x2df   :  { %v3222_v10 = vadd.f32 %v776_v8, %v773_v6  ;;  %v3824_v6 = vld [vmem:[#allocation15_spill] sm:$0xff] }
 0x2e1   :  { %v785_v11 = vrot.slane %v3222_v10, %v3139_v4  ;;  %v807_v57 = vrot.slane %v3222_v10, 2 }
 0x2e3   :  { %v786_v62 = vcombine.high %v785_v11, %v785_v11  ;;  %v793_v63 = vrot.slane %v785_v11, %v3139_v4  ;;  %874 = vmatmul.mubr.f32.vlgmr.msra.gmra.mxu1 %v807_v57  ;;  %2341 = vmatmul.mubr.f32.vlgmr.msra.gmra.mxu0 %v807_v57  ;;  %v3825_v57 = vld [vmem:[#allocation26_spill] sm:$0xff] }
 0x2e4   :  { %1013 = vmatpush1.msra.mxu1 %v2846_v15  ;;  %2344 = vmatpush3.msra.mxu0 %v2850_v16 }
 0x2e5   :  { %v800_v54 = vrot.slane %v786_v62, %v3139_v4  ;;  %v801_v58 = vcombine.high %v793_v63, %v793_v63  ;;  %1014 = vmatprep.subr.mxu1 %v2852_v17  ;;  %2345 = vmatprep.subr.mxu0 %v3806_v2 }
 0x2e6   :  { %1015 = vmatpush1.msra.mxu1 %v2856_v18  ;;  %2346 = vmatpush3.msra.mxu0 %v2861_v19 }
 0x2e7   :  { %v802_v9 = vcombine.high %v800_v54, %v800_v54  ;;  %805 = vst [vmem:[#allocation8 + $0x1] sm:$0x1] %v801_v58  ;;  %1016 = vmatprep.subr.mxu1 %v2863_v20  ;;  %2347 = vmatprep.subr.mxu0 %v3806_v2 }
 0x2e8   :  { %1017 = vmatpush1.msra.mxu1 %v2867_v21  ;;  %2348 = vmatpush3.msra.mxu0 %v2871_v22 }
 0x2e9   :  { %806 = vst [vmem:[#allocation8 + $0x9] sm:$0x1] %v802_v9  ;;  %1018 = vmatprep.subr.mxu1 %v2873_v23  ;;  %2349 = vmatprep.subr.mxu0 %v3806_v2 }
 0x2ea   :  { %1019 = vmatpush1.msra.mxu1 %v2877_v24  ;;  %2350 = vmatpush3.msra.mxu0 %v2881_v25 }
 0x2eb   :  { %1020 = vmatprep.subr.mxu1 %v2883_v26  ;;  %2351 = vmatprep.subr.mxu0 %v3806_v2 }
 0x2ec   :  { %1021 = vmatpush1.msra.mxu1 %v2887_v27  ;;  %2352 = vmatpush3.msra.mxu0 %v2891_v28 }
 0x2ed   :  { %1022 = vmatprep.subr.mxu1 %v2893_v29  ;;  %2353 = vmatprep.subr.mxu0 %v3806_v2 }
 0x2ee   :  { %1023 = vmatpush1.msra.mxu1 %v2897_v30  ;;  %2354 = vmatpush3.msra.mxu0 %v2901_v31 }
 0x2ef   :  { %1024 = vmatprep.subr.mxu1 %v2903_v32  ;;  %2355 = vmatprep.subr.mxu0 %v3806_v2 }
 0x2f0   :  { %1025 = vmatpush1.msra.mxu1 %v2907_v33  ;;  %2356 = vmatpush3.msra.mxu0 %v2911_v34 }
 0x2f1   :  { %1026 = vmatprep.subr.mxu1 %v2913_v35  ;;  %2357 = vmatprep.subr.mxu0 %v3806_v2 }
 0x2f2   :  { %1027 = vmatpush1.msra.mxu1 %v2917_v36  ;;  %2358 = vmatpush3.msra.mxu0 %v2921_v37 }
 0x2f3   :  { %1028 = vmatprep.subr.mxu1 %v2923_v38  ;;  %2359 = vmatprep.subr.mxu0 %v3806_v2 }
 0x2f4   :  { %1029 = vmatpush1.msra.mxu1 %v2927_v39  ;;  %2360 = vmatpush3.msra.mxu0 %v2931_v40 }
 0x2f5   :  { %1030 = vmatprep.subr.mxu1 %v2933_v41  ;;  %2361 = vmatprep.subr.mxu0 %v3806_v2 }
 0x2f6   :  { %1031 = vmatpush1.msra.mxu1 %v2937_v42  ;;  %2362 = vmatpush3.msra.mxu0 %v2941_v43 }
 0x2f7   :  { %1032 = vmatprep.subr.mxu1 %v2943_v44  ;;  %2363 = vmatprep.subr.mxu0 %v3806_v2 }
 0x2f8   :  { %1033 = vmatpush1.msra.mxu1 %v2958_v45  ;;  %2364 = vmatpush3.msra.mxu0 %v2960_v46 }
 0x2f9   :  { %1034 = vmatprep.subr.mxu1 %v2964_v47  ;;  %2365 = vmatprep.subr.mxu0 %v3806_v2 }
 0x2fa   :  { %1035 = vmatpush1.msra.mxu1 %v2968_v48  ;;  %2366 = vmatpush3.msra.mxu0 %v2970_v49 }
 0x2fb   :  { %1036 = vmatprep.subr.mxu1 %v2974_v50  ;;  %2367 = vmatprep.subr.mxu0 %v3806_v2 }
 0x2fc   :  { %1037 = vmatpush1.msra.mxu1 %v2978_v51  ;;  %2368 = vmatpush3.msra.mxu0 %v2980_v52 }
 0x2fd   :  { %1038 = vmatprep.subr.mxu1 %v2982_v53  ;;  %2369 = vmatprep.subr.mxu0 %v3806_v2 }
 0x2fe   :  { %1039 = vmatpush1.msra.mxu1 %v3816_v12  ;;  %2370 = vmatpush3.msra.mxu0 %v3817_v60 }
 0x2ff   :  { %1040 = vmatprep.subr.mxu1 %v3818_v1  ;;  %2371 = vmatprep.subr.mxu0 %v3806_v2 }
 0x300   :  { %1041 = vmatpush1.msra.mxu1 %v3819_v7  ;;  %2372 = vmatpush3.msra.mxu0 %v3820_v14 }
 0x301   :  { %1042 = vmatprep.subr.mxu1 %v3821_v5  ;;  %2373 = vmatprep.subr.mxu0 %v3806_v2 }
 0x302   :  { %1043 = vmatpush1.msra.mxu1 %v3822_v56  ;;  %1076 = vmatprep.mubr.f32.mxu1 %v3806_v2 }
 0x303   :  { %2374 = vmatpush3.msra.mxu0 %v3823_v13  ;;  %2375 = vmatprep.mubr.msk.f32.mxu0 %vm2750_vm0, %v3806_v2 }
 0x304   :  { %1217 = vmatprep.subr.mxu1 %v3824_v6  ;;  %2378 = vmatprep.subr.mxu0 %v3806_v2 }
 0x3a3   :  { %v875_v8 = vpop.f32.mrf.mxu1  ;;  %v946_v11 = vpop.f32.mrf.mxu0 }
 0x3a4   :  { %v876_v62 = vadd.f32 %v875_v8, %v3825_v57  ;;  %v947_v8 = vadd.f32 %v946_v11, %v3131_v3 }
 0x3a5   :  { %v877_v63 = vpop.f32.mrf.mxu1  ;;  %v2342_v54 = vpop.f32.mrf.mxu0 }
 0x3a6   :  { %v951_v58 = vrot.slane %v876_v62, 4  ;;  %v878_v9 = vadd.f32 %v877_v63, %v3115_v61  ;;  %v971_v54 = vrot.slane %v947_v8, 4  ;;  %v3397_v8 = vld [vmem:[#allocation6 + $0x158] sm:$0xff] }
 0x3a8   :  { %v953_v56 = vadd.f32 %v951_v58, %v3117_v59  ;;  %v961_v13 = vrot.slane %v878_v9, 4 }
 0x3aa   :  { %v2069_v5 = vmul.f32 -1.442695, %v953_v56  ;;  %v963_v14 = vadd.f32 %v961_v13, %v3127_v55  ;;  %v978_v13 = vrot.slane %v3222_v10, 6  ;;  %v3390_v10 = vld [vmem:[#allocation6 + $0x168] sm:$0xff] }
 0x3ac   :  { %2549 = vpow2.f32 %v2069_v5  ;;  %v2070_v7 = vmul.f32 -1.442695, %v963_v14 }
 0x3ae   :  { %2551 = vpow2.f32 %v2070_v7 }
 0x3b9   :  { %v2550_v6 = vpop.eup %2549 }
 0x3ba   :  { %v957_v1 = vadd.f32 1.0, %v2550_v6 }
 0x3bb   :  { %v2552_v60 = vpop.eup %2551 }
 0x3bc   :  { %2553 = vrcp.f32 %v957_v1  ;;  %v967_v57 = vadd.f32 1.0, %v2552_v60 }
 0x3be   :  { %2555 = vrcp.f32 %v967_v57 }
 0x3c9   :  { %v2554_v62 = vpop.eup %2553 }
 0x3ca   :  { %v973_v12 = vmul.f32 %v2554_v62, %v971_v54  ;;  %v3401_v54 = vld [vmem:[#allocation6 + $0x150] sm:$0xff]  ;;  %v3404_v62 = vld [vmem:[#allocation6 + $0x160] sm:$0xff] }
 0x3cb   :  { %v2556_v56 = vpop.eup %2555 }
 0x3cc   :  { %v974_v63 = vadd.f32 %v973_v12, %v3135_v0  ;;  %v976_v5 = vsub.f32 1.0, %v2556_v56  ;;  %v980_v58 = vmul.f32 %v2556_v56, %v978_v13  ;;  %v3412_v13 = vld [vmem:[#allocation6 + $0x138] sm:$0xff] }
 0x3ce   :  { %2557 = vtanh.f32 %v974_v63 }
 0x3db   :  { %v2558_v14 = vpop.eup %2557 }
 0x3dc   :  { %v977_v7 = vmul.f32 %v2558_v14, %v976_v5  ;;  %v3408_v5 = vld [vmem:[#allocation6 + $0x140] sm:$0xff]  ;;  %v3415_v14 = vld [vmem:[#allocation6 + $0x148] sm:$0xff] }
 0x3de   :  { %v3303_v9 = vadd.f32 %v980_v58, %v977_v7  ;;  %v3418_v58 = vld [vmem:[#allocation6 + $0x128] sm:$0xff] }
 0x3e0   :  { %v983_v1 = vcombine.high %v3303_v9, %v3303_v9  ;;  %v1010_v60 = vrot.slane %v3303_v9, 4 }
 0x3e2   :  { %v990_v11 = vrot.slane %v983_v1, %v3139_v4  ;;  %1077 = vmatmul.mubr.f32.vlgmr.msra.gmra.mxu1 %v1010_v60  ;;  %2376 = vmatmul.mubr.f32.vlgmr.msra.gmra.mxu0 %v1010_v60  ;;  %v3425_v1 = vld [vmem:[#allocation6 + $0x130] sm:$0xff] }
 0x3e3   :  { %1218 = vmatpush1.msra.mxu1 %v2846_v15  ;;  %2379 = vmatpush3.msra.mxu0 %v2850_v16  ;;  %v3826_v15 = vld [vmem:[#allocation16_spill] sm:$0xff]  ;;  %v3827_v16 = vld [vmem:[#allocation17_spill] sm:$0xff]  ;;  %v3428_v60 = vld [vmem:[#allocation6 + $0x110] sm:$0xff] }
 0x3e4   :  { %v991_v12 = vcombine.high %v990_v11, %v990_v11  ;;  %2071 = vst.sshfl [vmem:[#allocation8 + $0x2] sm:$0x1 pattern:$0x73625140] %v990_v11  ;;  %1219 = vmatprep.subr.mxu1 %v2852_v17  ;;  %2380 = vmatprep.subr.mxu0 %v3806_v2  ;;  %v3828_v17 = vld [vmem:[#allocation18_spill] sm:$0xff] }
 0x3e5   :  { %1220 = vmatpush1.msra.mxu1 %v2856_v18  ;;  %2381 = vmatpush3.msra.mxu0 %v2861_v19  ;;  %v3829_v18 = vld [vmem:[#allocation19_spill] sm:$0xff]  ;;  %v3830_v19 = vld [vmem:[#allocation20_spill] sm:$0xff]  ;;  %v3432_v11 = vld [vmem:[#allocation6 + $0x108] sm:$0xff] }
 0x3e6   :  { %2072 = vst.sshfl [vmem:[#allocation8 + $0xa] sm:$0x1 pattern:$0x73625140] %v991_v12  ;;  %1221 = vmatprep.subr.mxu1 %v2863_v20  ;;  %2382 = vmatprep.subr.mxu0 %v3806_v2  ;;  %v3831_v20 = vld [vmem:[#allocation21_spill] sm:$0xff]  ;;  %v3435_v12 = vld [vmem:[#allocation6 + $0x118] sm:$0xff] }
 0x3e7   :  { %1222 = vmatpush1.msra.mxu1 %v2867_v21  ;;  %2383 = vmatpush3.msra.mxu0 %v2871_v22  ;;  %v3832_v21 = vld [vmem:[#allocation22_spill] sm:$0xff]  ;;  %v3833_v22 = vld [vmem:[#allocation23_spill] sm:$0xff] }
 0x3e8   :  { %1223 = vmatprep.subr.mxu1 %v2873_v23  ;;  %2384 = vmatprep.subr.mxu0 %v3806_v2  ;;  %v3374_v23 = vld [vmem:[#allocation6 + $0x170] sm:$0xff] }
 0x3e9   :  { %1224 = vmatpush1.msra.mxu1 %v2877_v24  ;;  %2385 = vmatpush3.msra.mxu0 %v2881_v25  ;;  %3834 = vst [vmem:[#allocation15_spill] sm:$0xff] %v3374_v23 }
 0x3ea   :  { %1225 = vmatprep.subr.mxu1 %v2883_v26  ;;  %2386 = vmatprep.subr.mxu0 %v3806_v2  ;;  %v3835_v26 = vld [vmem:[#allocation26_spill] sm:$0xff] }
 0x3eb   :  { %1226 = vmatpush1.msra.mxu1 %v2887_v27  ;;  %2387 = vmatpush3.msra.mxu0 %v2891_v28 }
 0x3ec   :  { %1227 = vmatprep.subr.mxu1 %v2893_v29  ;;  %2388 = vmatprep.subr.mxu0 %v3806_v2 }
 0x3ed   :  { %1228 = vmatpush1.msra.mxu1 %v2897_v30  ;;  %2389 = vmatpush3.msra.mxu0 %v2901_v31 }
 0x3ee   :  { %1229 = vmatprep.subr.mxu1 %v2903_v32  ;;  %2390 = vmatprep.subr.mxu0 %v3806_v2 }
 0x3ef   :  { %1230 = vmatpush1.msra.mxu1 %v2907_v33  ;;  %2391 = vmatpush3.msra.mxu0 %v2911_v34 }
 0x3f0   :  { %1231 = vmatprep.subr.mxu1 %v2913_v35  ;;  %2392 = vmatprep.subr.mxu0 %v3806_v2 }
 0x3f1   :  { %1232 = vmatpush1.msra.mxu1 %v2917_v36  ;;  %2393 = vmatpush3.msra.mxu0 %v2921_v37 }
 0x3f2   :  { %1233 = vmatprep.subr.mxu1 %v2923_v38  ;;  %2394 = vmatprep.subr.mxu0 %v3806_v2 }
 0x3f3   :  { %1234 = vmatpush1.msra.mxu1 %v2927_v39  ;;  %2395 = vmatpush3.msra.mxu0 %v2931_v40 }
 0x3f4   :  { %1235 = vmatprep.subr.mxu1 %v2933_v41  ;;  %2396 = vmatprep.subr.mxu0 %v3806_v2 }
 0x3f5   :  { %1236 = vmatpush1.msra.mxu1 %v2937_v42  ;;  %2397 = vmatpush3.msra.mxu0 %v2941_v43 }
 0x3f6   :  { %1237 = vmatprep.subr.mxu1 %v2943_v44  ;;  %2398 = vmatprep.subr.mxu0 %v3806_v2 }
 0x3f7   :  { %1238 = vmatpush1.msra.mxu1 %v2958_v45  ;;  %2399 = vmatpush3.msra.mxu0 %v2960_v46 }
 0x3f8   :  { %1239 = vmatprep.subr.mxu1 %v2964_v47  ;;  %2400 = vmatprep.subr.mxu0 %v3806_v2 }
 0x3f9   :  { %1240 = vmatpush1.msra.mxu1 %v2968_v48  ;;  %2401 = vmatpush3.msra.mxu0 %v2970_v49  ;;  %v1181_v48 = vrot.slane %v3303_v9, 6  ;;  %v3422_v9 = vld [vmem:[#allocation6 + $0x120] sm:$0xff] }
 0x3fa   :  { %1241 = vmatprep.subr.mxu1 %v2974_v50  ;;  %2402 = vmatprep.subr.mxu0 %v3806_v2 }
 0x3fb   :  { %1242 = vmatpush1.msra.mxu1 %v2978_v51  ;;  %2403 = vmatpush3.msra.mxu0 %v2980_v52 }
 0x3fc   :  { %1243 = vmatprep.subr.mxu1 %v2982_v53  ;;  %2404 = vmatprep.subr.mxu0 %v3806_v2 }
 0x3fd   :  { %1244 = vmatpush1.msra.mxu1 %v3826_v15  ;;  %2405 = vmatpush3.msra.mxu0 %v3827_v16  ;;  %v3438_v15 = vld [vmem:[#allocation6 + $0xf8] sm:$0xff]  ;;  %v3442_v16 = vld [vmem:[#allocation6 + $0xf0] sm:$0xff] }
 0x3fe   :  { %1245 = vmatprep.subr.mxu1 %v3828_v17  ;;  %2406 = vmatprep.subr.mxu0 %v3806_v2  ;;  %v3445_v17 = vld [vmem:[#allocation6 + $0x100] sm:$0xff] }
 0x3ff   :  { %1246 = vmatpush1.msra.mxu1 %v3829_v18  ;;  %2407 = vmatpush3.msra.mxu0 %v3830_v19  ;;  %v3448_v18 = vld [vmem:[#allocation6 + $0xe0] sm:$0xff]  ;;  %v3452_v19 = vld [vmem:[#allocation6 + $0xd8] sm:$0xff] }
 0x400   :  { %1247 = vmatprep.subr.mxu1 %v3831_v20  ;;  %2408 = vmatprep.subr.mxu0 %v3806_v2  ;;  %v3455_v20 = vld [vmem:[#allocation6 + $0xe8] sm:$0xff] }
 0x401   :  { %1248 = vmatpush1.msra.mxu1 %v3832_v21  ;;  %1281 = vmatprep.mubr.f32.mxu1 %v3806_v2  ;;  %v3458_v21 = vld [vmem:[#allocation6 + $0xc8] sm:$0xff] }
 0x402   :  { %2409 = vmatpush3.msra.mxu0 %v3833_v22  ;;  %2410 = vmatprep.mubr.msk.f32.mxu0 %vm2750_vm0, %v3806_v2  ;;  %v3462_v22 = vld [vmem:[#allocation6 + $0xc0] sm:$0xff] }
 0x403   :  { %1406 = vmatprep.subr.mxu1 %v3374_v23  ;;  %2413 = vmatprep.subr.mxu0 %v3806_v2 }
 0x4a2   :  { %v1078_v24 = vpop.f32.mrf.mxu1  ;;  %v1149_v25 = vpop.f32.mrf.mxu0 }
 0x4a3   :  { %v1079_v27 = vadd.f32 %v1078_v24, %v3835_v26  ;;  %v1150_v40 = vadd.f32 %v1149_v25, %v3131_v3  ;;  %v3465_v24 = vld [vmem:[#allocation6 + $0xd0] sm:$0xff] }
 0x4a4   :  { %v1080_v28 = vpop.f32.mrf.mxu1  ;;  %v2377_v29 = vpop.f32.mrf.mxu0  ;;  %v3468_v25 = vld [vmem:[#allocation6 + $0xb0] sm:$0xff] }
 0x4a5   :  { %v1154_v30 = vrot.slane %v1079_v27, 2  ;;  %v1081_v31 = vadd.f32 %v1080_v28, %v3115_v61  ;;  %v1174_v42 = vrot.slane %v1150_v40, 2  ;;  %v3472_v27 = vld [vmem:[#allocation6 + $0xa8] sm:$0xff]  ;;  %v3475_v28 = vld [vmem:[#allocation6 + $0xb8] sm:$0xff] }
 0x4a6   :  { %v3478_v29 = vld [vmem:[#allocation6 + $0x98] sm:$0xff] }
 0x4a7   :  { %v1156_v32 = vadd.f32 %v1154_v30, %v3117_v59  ;;  %v1164_v34 = vrot.slane %v1081_v31, 2  ;;  %v3482_v30 = vld [vmem:[#allocation6 + $0x90] sm:$0xff]  ;;  %v3485_v31 = vld [vmem:[#allocation6 + $0xa0] sm:$0xff]  ;;  %v3515_v40 = vld [vmem:[#allocation6 + $0x58] sm:$0xff] }
 0x4a9   :  { %v2073_v33 = vmul.f32 -1.442695, %v1156_v32  ;;  %v1166_v35 = vadd.f32 %v1164_v34, %v3127_v55  ;;  %v3488_v32 = vld [vmem:[#allocation6 + $0x80] sm:$0xff]  ;;  %v3495_v34 = vld [vmem:[#allocation6 + $0x88] sm:$0xff] }
 0x4ab   :  { %2559 = vpow2.f32 %v2073_v33  ;;  %v2074_v36 = vmul.f32 -1.442695, %v1166_v35  ;;  %v3492_v33 = vld [vmem:[#allocation6 + $0x78] sm:$0xff]  ;;  %v3498_v35 = vld [vmem:[#allocation6 + $0x68] sm:$0xff] }
 0x4ad   :  { %2561 = vpow2.f32 %v2074_v36  ;;  %v3502_v36 = vld [vmem:[#allocation6 + $0x60] sm:$0xff] }
 0x4b8   :  { %v2560_v37 = vpop.eup %2559 }
 0x4b9   :  { %v1160_v38 = vadd.f32 1.0, %v2560_v37  ;;  %v3505_v37 = vld [vmem:[#allocation6 + $0x70] sm:$0xff] }
 0x4ba   :  { %v2562_v39 = vpop.eup %2561 }
 0x4bb   :  { %2563 = vrcp.f32 %v1160_v38  ;;  %v1170_v41 = vadd.f32 1.0, %v2562_v39  ;;  %v3508_v38 = vld [vmem:[#allocation6 + $0x50] sm:$0xff]  ;;  %v3512_v39 = vld [vmem:[#allocation6 + $0x48] sm:$0xff] }
 0x4bd   :  { %2565 = vrcp.f32 %v1170_v41  ;;  %v3518_v41 = vld [vmem:[#allocation6 + $0x38] sm:$0xff] }
 0x4c8   :  { %v2564_v43 = vpop.eup %2563 }
 0x4c9   :  { %v1176_v44 = vmul.f32 %v2564_v43, %v1174_v42  ;;  %v3522_v42 = vld [vmem:[#allocation6 + $0x30] sm:$0xff]  ;;  %v3525_v43 = vld [vmem:[#allocation6 + $0x40] sm:$0xff] }
 0x4ca   :  { %v2566_v46 = vpop.eup %2565  ;;  %3836 = vst [vmem:[#allocation16_spill] sm:$0xff] %v3522_v42  ;;  %3837 = vst [vmem:[#allocation17_spill] sm:$0xff] %v3525_v43 }
 0x4cb   :  { %v1177_v45 = vadd.f32 %v1176_v44, %v3135_v0  ;;  %v1179_v47 = vsub.f32 1.0, %v2566_v46  ;;  %v1183_v51 = vmul.f32 %v2566_v46, %v1181_v48  ;;  %v3393_v0 = vld [vmem:[#allocation6 + $0x178] sm:$0xff]  ;;  %v3528_v44 = vld [vmem:[#allocation6 + $0x20] sm:$0xff]  ;;  %v3535_v46 = vld [vmem:[#allocation6 + $0x28] sm:$0xff] }
 0x4cc   :  { %3838 = vst [vmem:[#allocation18_spill] sm:$0xff] %v3528_v44  ;;  %3840 = vst [vmem:[#allocation20_spill] sm:$0xff] %v3535_v46  ;;  %v3542_v48 = vld [vmem:[#allocation6] sm:$0xff] }
 0x4cd   :  { %2567 = vtanh.f32 %v1177_v45  ;;  %v3532_v45 = vld [vmem:[#allocation6 + $0x18] sm:$0xff]  ;;  %3842 = vst [vmem:[#allocation22_spill] sm:$0xff] %v3542_v48 }
 0x4ce   :  { %3839 = vst [vmem:[#allocation19_spill] sm:$0xff] %v3532_v45 }
 0x4da   :  { %v2568_v49 = vpop.eup %2567 }
 0x4db   :  { %v1180_v50 = vmul.f32 %v2568_v49, %v1179_v47  ;;  %v3538_v47 = vld [vmem:[#allocation6 + $0x8] sm:$0xff]  ;;  %v3546_v49 = vld [vmem:[#allocation6 + $0x10] sm:$0xff] }
 0x4dc   :  { %3841 = vst [vmem:[#allocation21_spill] sm:$0xff] %v3538_v47  ;;  %3843 = vst [vmem:[#allocation23_spill] sm:$0xff] %v3546_v49 }
 0x4dd   :  { %v1184_v52 = vadd.f32 %v1183_v51, %v1180_v50 }
 0x4df   :  { %v1186_v53 = vcombine.high %v1184_v52, %v1184_v52  ;;  %v3385_v55 = vrot.slane %v1184_v52, 6 }
 0x4e1   :  { %v1193_v59 = vrot.slane %v1186_v53, %v3139_v4  ;;  %1282 = vmatmul.mubr.f32.vlgmr.msra.gmra.mxu1 %v3385_v55  ;;  %2411 = vmatmul.mubr.f32.vlgmr.msra.gmra.mxu0 %v3385_v55 }
 0x4e2   :  { %1407 = vmatpush1.msra.mxu1 %v3390_v10  ;;  %2414 = vmatpush3.msra.mxu0 %v3393_v0 }
 0x4e3   :  { %v1194_v57 = vcombine.high %v1193_v59, %v1193_v59  ;;  %v1201_v6 = vrot.slane %v1193_v59, %v3139_v4  ;;  %1408 = vmatprep.subr.mxu1 %v3397_v8  ;;  %2415 = vmatprep.subr.mxu0 %v3806_v2 }
 0x4e4   :  { %1409 = vmatpush1.msra.mxu1 %v3401_v54  ;;  %2416 = vmatpush3.msra.mxu0 %v3404_v62 }
 0x4e5   :  { %v1208_v63 = vrot.slane %v1194_v57, %v3139_v4  ;;  %v1209_v56 = vcombine.high %v1201_v6, %v1201_v6  ;;  %1410 = vmatprep.subr.mxu1 %v3408_v5  ;;  %2417 = vmatprep.subr.mxu0 %v3806_v2  ;;  %v3844_v57 = vld [vmem:[#allocation25_spill] sm:$0xff] }
 0x4e6   :  { %1411 = vmatpush1.msra.mxu1 %v3412_v13  ;;  %2418 = vmatpush3.msra.mxu0 %v3415_v14 }
 0x4e7   :  { %v1210_v7 = vcombine.high %v1208_v63, %v1208_v63  ;;  %1213 = vst [vmem:[#allocation8 + $0x3] sm:$0x1] %v1209_v56  ;;  %1412 = vmatprep.subr.mxu1 %v3418_v58  ;;  %2419 = vmatprep.subr.mxu0 %v3806_v2 }
 0x4e8   :  { %1413 = vmatpush1.msra.mxu1 %v3422_v9  ;;  %2420 = vmatpush3.msra.mxu0 %v3425_v1 }
 0x4e9   :  { %1214 = vst [vmem:[#allocation8 + $0xb] sm:$0x1] %v1210_v7  ;;  %1414 = vmatprep.subr.mxu1 %v3428_v60  ;;  %2421 = vmatprep.subr.mxu0 %v3806_v2  ;;  %v3845_v7 = vld [vmem:[#allocation29_spill] sm:$0xff] }
 0x4ea   :  { %1415 = vmatpush1.msra.mxu1 %v3432_v11  ;;  %2422 = vmatpush3.msra.mxu0 %v3435_v12 }
 0x4eb   :  { %1416 = vmatprep.subr.mxu1 %v3438_v15  ;;  %2423 = vmatprep.subr.mxu0 %v3806_v2 }
 0x4ec   :  { %1417 = vmatpush1.msra.mxu1 %v3442_v16  ;;  %2424 = vmatpush3.msra.mxu0 %v3445_v17 }
 0x4ed   :  { %1418 = vmatprep.subr.mxu1 %v3448_v18  ;;  %2425 = vmatprep.subr.mxu0 %v3806_v2 }
 0x4ee   :  { %1419 = vmatpush1.msra.mxu1 %v3452_v19  ;;  %2426 = vmatpush3.msra.mxu0 %v3455_v20 }
 0x4ef   :  { %1420 = vmatprep.subr.mxu1 %v3458_v21  ;;  %2427 = vmatprep.subr.mxu0 %v3806_v2 }
 0x4f0   :  { %1421 = vmatpush1.msra.mxu1 %v3462_v22  ;;  %2428 = vmatpush3.msra.mxu0 %v3465_v24 }
 0x4f1   :  { %1422 = vmatprep.subr.mxu1 %v3468_v25  ;;  %2429 = vmatprep.subr.mxu0 %v3806_v2 }
 0x4f2   :  { %1423 = vmatpush1.msra.mxu1 %v3472_v27  ;;  %2430 = vmatpush3.msra.mxu0 %v3475_v28 }
 0x4f3   :  { %1424 = vmatprep.subr.mxu1 %v3478_v29  ;;  %2431 = vmatprep.subr.mxu0 %v3806_v2 }
 0x4f4   :  { %1425 = vmatpush1.msra.mxu1 %v3482_v30  ;;  %2432 = vmatpush3.msra.mxu0 %v3485_v31 }
 0x4f5   :  { %1426 = vmatprep.subr.mxu1 %v3488_v32  ;;  %2433 = vmatprep.subr.mxu0 %v3806_v2 }
 0x4f6   :  { %1427 = vmatpush1.msra.mxu1 %v3492_v33  ;;  %2434 = vmatpush3.msra.mxu0 %v3495_v34 }
 0x4f7   :  { %1428 = vmatprep.subr.mxu1 %v3498_v35  ;;  %2435 = vmatprep.subr.mxu0 %v3806_v2 }
 0x4f8   :  { %1429 = vmatpush1.msra.mxu1 %v3502_v36  ;;  %2436 = vmatpush3.msra.mxu0 %v3505_v37 }
 0x4f9   :  { %1430 = vmatprep.subr.mxu1 %v3508_v38  ;;  %2437 = vmatprep.subr.mxu0 %v3806_v2 }
 0x4fa   :  { %1431 = vmatpush1.msra.mxu1 %v3512_v39  ;;  %2438 = vmatpush3.msra.mxu0 %v3515_v40 }
 0x4fb   :  { %1432 = vmatprep.subr.mxu1 %v3518_v41  ;;  %2439 = vmatprep.subr.mxu0 %v3806_v2 }
 0x4fc   :  { %1433 = vmatpush1.msra.mxu1 %v3522_v42  ;;  %2440 = vmatpush3.msra.mxu0 %v3525_v43 }
 0x4fd   :  { %1434 = vmatprep.subr.mxu1 %v3528_v44  ;;  %2441 = vmatprep.subr.mxu0 %v3806_v2 }
 0x4fe   :  { %1435 = vmatpush1.msra.mxu1 %v3532_v45  ;;  %2442 = vmatpush3.msra.mxu0 %v3535_v46 }
 0x4ff   :  { %1436 = vmatprep.subr.mxu1 %v3538_v47  ;;  %2443 = vmatprep.subr.mxu0 %v3806_v2 }
 0x500   :  { %1437 = vmatpush1.msra.mxu1 %v3542_v48  ;;  %1470 = vmatprep.mubr.f32.mxu1 %v3806_v2 }
 0x501   :  { %2444 = vmatpush3.msra.mxu0 %v3546_v49  ;;  %2445 = vmatprep.mubr.msk.f32.mxu0 %vm2750_vm0, %v3806_v2  ;;  %v3846_v49 = vld [vmem:[#allocation27_spill] sm:$0xff] }
 0x502   :  { %1610 = vmatprep.subr.mxu1 %v3374_v23  ;;  %2448 = vmatprep.subr.mxu0 %v3806_v2  ;;  %v3558_v48 = vadd.f32 %v3846_v49, %v3845_v7 }
 0x5a1   :  { %v1283_v50 = vpop.f32.mrf.mxu1  ;;  %v1354_v51 = vpop.f32.mrf.mxu0 }
 0x5a2   :  { %v1284_v52 = vadd.f32 %v1283_v50, %v3835_v26 }
 0x5a3   :  { %v1285_v53 = vpop.f32.mrf.mxu1  ;;  %v2412_v59 = vpop.f32.mrf.mxu0 }
 0x5a4   :  { %v1358_v6 = vadd.f32 %v1284_v52, %v3844_v57  ;;  %v1286_v56 = vadd.f32 %v1285_v53, %v3115_v61  ;;  %v1355_v59 = vadd.f32 %v1354_v51, %v3131_v3  ;;  %v3847_v53 = vld [vmem:[#allocation24_spill] sm:$0xff]  ;;  %v3851_v51 = vld [vmem:[#allocation22_spill] sm:$0xff] }
 0x5a6   :  { %v2075_v63 = vmul.f32 -1.442695, %v1358_v6  ;;  %v1365_v23 = vadd.f32 %v1286_v56, %v3558_v48  ;;  %v3853_v56 = vld [vmem:[#allocation15_spill] sm:$0xff] }
 0x5a8   :  { %2569 = vpow2.f32 %v2075_v63  ;;  %v2076_v47 = vmul.f32 -1.442695, %v1365_v23 }
 0x5aa   :  { %2571 = vpow2.f32 %v2076_v47 }
 0x5b5   :  { %v2570_v46 = vpop.eup %2569 }
 0x5b6   :  { %v1362_v45 = vadd.f32 1.0, %v2570_v46  ;;  %v3850_v46 = vld [vmem:[#allocation21_spill] sm:$0xff] }
 0x5b7   :  { %v2572_v50 = vpop.eup %2571 }
 0x5b8   :  { %2573 = vrcp.f32 %v1362_v45  ;;  %v1369_v26 = vadd.f32 1.0, %v2572_v50 }
 0x5ba   :  { %2575 = vrcp.f32 %v1369_v26 }
 0x5c5   :  { %v2574_v52 = vpop.eup %2573 }
 0x5c6   :  { %v1372_v6 = vmul.f32 %v2574_v52, %v1355_v59  ;;  %v3854_v52 = vld [vmem:[#allocation26_spill] sm:$0xff] }
 0x5c7   :  { %v2576_v49 = vpop.eup %2575 }
 0x5c8   :  { %v1373_v57 = vadd.f32 %v1372_v6, %v3847_v53  ;;  %v1375_v7 = vsub.f32 1.0, %v2576_v49  ;;  %v1377_v23 = vmul.f32 %v2576_v49, %v3385_v55  ;;  %v3849_v55 = vld [vmem:[#allocation20_spill] sm:$0xff] }
 0x5ca   :  { %2577 = vtanh.f32 %v1373_v57  ;;  %v3852_v57 = vld [vmem:[#allocation23_spill] sm:$0xff] }
 0x5d7   :  { %v2578_v63 = vpop.eup %2577 }
 0x5d8   :  { %v1376_v61 = vmul.f32 %v2578_v63, %v1375_v7 }
 0x5da   :  { %v3564_v47 = vadd.f32 %v1377_v23, %v1376_v61  ;;  %v3848_v61 = vld [vmem:[#allocation19_spill] sm:$0xff]  ;;  %v3855_v23 = vld [vmem:[#allocation28_spill] sm:$0xff] }
 0x5dc   :  { %v1386_v45 = vrot.slane %v3564_v47, %v3139_v4  ;;  %1471 = vmatmul.mubr.f32.vlgmr.msra.gmra.mxu1 %v3564_v47  ;;  %2446 = vmatmul.mubr.f32.vlgmr.msra.gmra.mxu0 %v3564_v47 }
 0x5dd   :  { %1611 = vmatpush1.msra.mxu1 %v3390_v10  ;;  %2449 = vmatpush3.msra.mxu0 %v3393_v0 }
 0x5de   :  { %v1387_v26 = vcombine.high %v1386_v45, %v1386_v45  ;;  %2077 = vst.sshfl [vmem:[#allocation8 + $0x4] sm:$0x1 pattern:$0x73625140] %v1386_v45  ;;  %1612 = vmatprep.subr.mxu1 %v3397_v8  ;;  %2450 = vmatprep.subr.mxu0 %v3806_v2 }
 0x5df   :  { %1613 = vmatpush1.msra.mxu1 %v3401_v54  ;;  %2451 = vmatpush3.msra.mxu0 %v3404_v62 }
 0x5e0   :  { %2078 = vst.sshfl [vmem:[#allocation8 + $0xc] sm:$0x1 pattern:$0x73625140] %v1387_v26  ;;  %1614 = vmatprep.subr.mxu1 %v3408_v5  ;;  %2452 = vmatprep.subr.mxu0 %v3806_v2  ;;  %v3856_v26 = vld [vmem:[#allocation25_spill] sm:$0xff] }
 0x5e1   :  { %1615 = vmatpush1.msra.mxu1 %v3412_v13  ;;  %2453 = vmatpush3.msra.mxu0 %v3415_v14 }
 0x5e2   :  { %1616 = vmatprep.subr.mxu1 %v3418_v58  ;;  %2454 = vmatprep.subr.mxu0 %v3806_v2 }
 0x5e3   :  { %1617 = vmatpush1.msra.mxu1 %v3422_v9  ;;  %2455 = vmatpush3.msra.mxu0 %v3425_v1 }
 0x5e4   :  { %1618 = vmatprep.subr.mxu1 %v3428_v60  ;;  %2456 = vmatprep.subr.mxu0 %v3806_v2 }
 0x5e5   :  { %1619 = vmatpush1.msra.mxu1 %v3432_v11  ;;  %2457 = vmatpush3.msra.mxu0 %v3435_v12 }
 0x5e6   :  { %1620 = vmatprep.subr.mxu1 %v3438_v15  ;;  %2458 = vmatprep.subr.mxu0 %v3806_v2 }
 0x5e7   :  { %1621 = vmatpush1.msra.mxu1 %v3442_v16  ;;  %2459 = vmatpush3.msra.mxu0 %v3445_v17 }
 0x5e8   :  { %1622 = vmatprep.subr.mxu1 %v3448_v18  ;;  %2460 = vmatprep.subr.mxu0 %v3806_v2 }
 0x5e9   :  { %1623 = vmatpush1.msra.mxu1 %v3452_v19  ;;  %2461 = vmatpush3.msra.mxu0 %v3455_v20 }
 0x5ea   :  { %1624 = vmatprep.subr.mxu1 %v3458_v21  ;;  %2462 = vmatprep.subr.mxu0 %v3806_v2 }
 0x5eb   :  { %1625 = vmatpush1.msra.mxu1 %v3462_v22  ;;  %2463 = vmatpush3.msra.mxu0 %v3465_v24 }
 0x5ec   :  { %1626 = vmatprep.subr.mxu1 %v3468_v25  ;;  %2464 = vmatprep.subr.mxu0 %v3806_v2 }
 0x5ed   :  { %1627 = vmatpush1.msra.mxu1 %v3472_v27  ;;  %2465 = vmatpush3.msra.mxu0 %v3475_v28 }
 0x5ee   :  { %1628 = vmatprep.subr.mxu1 %v3478_v29  ;;  %2466 = vmatprep.subr.mxu0 %v3806_v2 }
 0x5ef   :  { %1629 = vmatpush1.msra.mxu1 %v3482_v30  ;;  %2467 = vmatpush3.msra.mxu0 %v3485_v31 }
 0x5f0   :  { %1630 = vmatprep.subr.mxu1 %v3488_v32  ;;  %2468 = vmatprep.subr.mxu0 %v3806_v2 }
 0x5f1   :  { %1631 = vmatpush1.msra.mxu1 %v3492_v33  ;;  %2469 = vmatpush3.msra.mxu0 %v3495_v34 }
 0x5f2   :  { %1632 = vmatprep.subr.mxu1 %v3498_v35  ;;  %2470 = vmatprep.subr.mxu0 %v3806_v2 }
 0x5f3   :  { %1633 = vmatpush1.msra.mxu1 %v3502_v36  ;;  %2471 = vmatpush3.msra.mxu0 %v3505_v37 }
 0x5f4   :  { %1634 = vmatprep.subr.mxu1 %v3508_v38  ;;  %2472 = vmatprep.subr.mxu0 %v3806_v2 }
 0x5f5   :  { %1635 = vmatpush1.msra.mxu1 %v3512_v39  ;;  %2473 = vmatpush3.msra.mxu0 %v3515_v40 }
 0x5f6   :  { %1636 = vmatprep.subr.mxu1 %v3518_v41  ;;  %2474 = vmatprep.subr.mxu0 %v3806_v2 }
 0x5f7   :  { %1637 = vmatpush1.msra.mxu1 %v3522_v42  ;;  %2475 = vmatpush3.msra.mxu0 %v3525_v43 }
 0x5f8   :  { %1638 = vmatprep.subr.mxu1 %v3528_v44  ;;  %2476 = vmatprep.subr.mxu0 %v3806_v2 }
 0x5f9   :  { %1639 = vmatpush1.msra.mxu1 %v3848_v61  ;;  %2477 = vmatpush3.msra.mxu0 %v3849_v55 }
 0x5fa   :  { %1640 = vmatprep.subr.mxu1 %v3850_v46  ;;  %2478 = vmatprep.subr.mxu0 %v3806_v2 }
 0x5fb   :  { %1641 = vmatpush1.msra.mxu1 %v3851_v51  ;;  %1674 = vmatprep.mubr.f32.mxu1 %v3806_v2 }
 0x5fc   :  { %2479 = vmatpush3.msra.mxu0 %v3852_v57  ;;  %2480 = vmatprep.mubr.msk.f32.mxu0 %vm2750_vm0, %v3806_v2 }
 0x5fd   :  { %1813 = vmatprep.subr.mxu1 %v3853_v56  ;;  %2483 = vmatprep.subr.mxu0 %v3806_v2 }
 0x69c   :  { %v1472_v50 = vpop.f32.mrf.mxu1  ;;  %v1543_v59 = vpop.f32.mrf.mxu0 }
 0x69d   :  { %v1473_v6 = vadd.f32 %v1472_v50, %v3854_v52  ;;  %v1544_v50 = vadd.f32 %v1543_v59, %v3131_v3 }
 0x69e   :  { %v1474_v49 = vpop.f32.mrf.mxu1  ;;  %v2447_v7 = vpop.f32.mrf.mxu0 }
 0x69f   :  { %v1548_v63 = vrot.slane %v1473_v6, 6  ;;  %v1475_v45 = vadd.f32 %v1474_v49, %v3855_v23  ;;  %v1568_v7 = vrot.slane %v1544_v50, 6 }
 0x6a1   :  { %v1550_v51 = vadd.f32 %v1548_v63, %v3856_v26  ;;  %v1558_v57 = vrot.slane %v1475_v45, 6 }
 0x6a3   :  { %v2079_v46 = vmul.f32 -1.442695, %v1550_v51  ;;  %v1560_v55 = vadd.f32 %v1558_v57, %v3558_v48 }
 0x6a5   :  { %2579 = vpow2.f32 %v2079_v46  ;;  %v2080_v61 = vmul.f32 -1.442695, %v1560_v55  ;;  %v1575_v46 = vrot.slane %v3564_v47, 6 }
 0x6a7   :  { %2581 = vpow2.f32 %v2080_v61 }
 0x6b2   :  { %v2580_v56 = vpop.eup %2579 }
 0x6b3   :  { %v1554_v44 = vadd.f32 1.0, %v2580_v56 }
 0x6b4   :  { %v2582_v43 = vpop.eup %2581 }
 0x6b5   :  { %2583 = vrcp.f32 %v1554_v44  ;;  %v1564_v52 = vadd.f32 1.0, %v2582_v43 }
 0x6b7   :  { %2585 = vrcp.f32 %v1564_v52 }
 0x6c2   :  { %v2584_v6 = vpop.eup %2583 }
 0x6c3   :  { %v1570_v42 = vmul.f32 %v2584_v6, %v1568_v7 }
 0x6c4   :  { %v2586_v51 = vpop.eup %2585 }
 0x6c5   :  { %v1571_v49 = vadd.f32 %v1570_v42, %v3847_v53  ;;  %v1573_v57 = vsub.f32 1.0, %v2586_v51  ;;  %v1577_v63 = vmul.f32 %v2586_v51, %v1575_v46 }
 0x6c7   :  { %2587 = vtanh.f32 %v1571_v49 }
 0x6d4   :  { %v2588_v55 = vpop.eup %2587 }
 0x6d5   :  { %v1574_v61 = vmul.f32 %v2588_v55, %v1573_v57 }
 0x6d7   :  { %v3644_v45 = vadd.f32 %v1577_v63, %v1574_v61 }
 0x6d9   :  { %v1586_v44 = vrot.slane %v3644_v45, %v3139_v4  ;;  %v1608_v43 = vrot.slane %v3644_v45, 2 }
 0x6db   :  { %v1587_v59 = vcombine.high %v1586_v44, %v1586_v44  ;;  %v1594_v52 = vrot.slane %v1586_v44, %v3139_v4  ;;  %1675 = vmatmul.mubr.f32.vlgmr.msra.gmra.mxu1 %v1608_v43  ;;  %2481 = vmatmul.mubr.f32.vlgmr.msra.gmra.mxu0 %v1608_v43 }
 0x6dc   :  { %1814 = vmatpush1.msra.mxu1 %v3390_v10  ;;  %2484 = vmatpush3.msra.mxu0 %v3393_v0  ;;  %v3857_v10 = vld [vmem:[#allocation16_spill] sm:$0xff]  ;;  %v3858_v0 = vld [vmem:[#allocation17_spill] sm:$0xff] }
 0x6dd   :  { %v1601_v42 = vrot.slane %v1587_v59, %v3139_v4  ;;  %v1602_v47 = vcombine.high %v1594_v52, %v1594_v52  ;;  %1815 = vmatprep.subr.mxu1 %v3397_v8  ;;  %2485 = vmatprep.subr.mxu0 %v3806_v2  ;;  %v3859_v8 = vld [vmem:[#allocation18_spill] sm:$0xff] }
 0x6de   :  { %1816 = vmatpush1.msra.mxu1 %v3401_v54  ;;  %2486 = vmatpush3.msra.mxu0 %v3404_v62  ;;  %v3860_v54 = vld [vmem:[#allocation19_spill] sm:$0xff]  ;;  %v3861_v62 = vld [vmem:[#allocation20_spill] sm:$0xff] }
 0x6df   :  { %v1603_v56 = vcombine.high %v1601_v42, %v1601_v42  ;;  %1606 = vst [vmem:[#allocation8 + $0x5] sm:$0x1] %v1602_v47  ;;  %1817 = vmatprep.subr.mxu1 %v3408_v5  ;;  %2487 = vmatprep.subr.mxu0 %v3806_v2  ;;  %v3862_v5 = vld [vmem:[#allocation21_spill] sm:$0xff] }
 0x6e0   :  { %1818 = vmatpush1.msra.mxu1 %v3412_v13  ;;  %2488 = vmatpush3.msra.mxu0 %v3415_v14  ;;  %v3863_v13 = vld [vmem:[#allocation22_spill] sm:$0xff]  ;;  %v3864_v14 = vld [vmem:[#allocation23_spill] sm:$0xff] }
 0x6e1   :  { %1607 = vst [vmem:[#allocation8 + $0xd] sm:$0x1] %v1603_v56  ;;  %1819 = vmatprep.subr.mxu1 %v3418_v58  ;;  %2489 = vmatprep.subr.mxu0 %v3806_v2 }
 0x6e2   :  { %1820 = vmatpush1.msra.mxu1 %v3422_v9  ;;  %2490 = vmatpush3.msra.mxu0 %v3425_v1  ;;  %v3865_v1 = vld [vmem:[#allocation26_spill] sm:$0xff] }
 0x6e3   :  { %1821 = vmatprep.subr.mxu1 %v3428_v60  ;;  %2491 = vmatprep.subr.mxu0 %v3806_v2 }
 0x6e4   :  { %1822 = vmatpush1.msra.mxu1 %v3432_v11  ;;  %2492 = vmatpush3.msra.mxu0 %v3435_v12 }
 0x6e5   :  { %1823 = vmatprep.subr.mxu1 %v3438_v15  ;;  %2493 = vmatprep.subr.mxu0 %v3806_v2 }
 0x6e6   :  { %1824 = vmatpush1.msra.mxu1 %v3442_v16  ;;  %2494 = vmatpush3.msra.mxu0 %v3445_v17 }
 0x6e7   :  { %1825 = vmatprep.subr.mxu1 %v3448_v18  ;;  %2495 = vmatprep.subr.mxu0 %v3806_v2 }
 0x6e8   :  { %1826 = vmatpush1.msra.mxu1 %v3452_v19  ;;  %2496 = vmatpush3.msra.mxu0 %v3455_v20 }
 0x6e9   :  { %1827 = vmatprep.subr.mxu1 %v3458_v21  ;;  %2497 = vmatprep.subr.mxu0 %v3806_v2 }
 0x6ea   :  { %1828 = vmatpush1.msra.mxu1 %v3462_v22  ;;  %2498 = vmatpush3.msra.mxu0 %v3465_v24 }
 0x6eb   :  { %1829 = vmatprep.subr.mxu1 %v3468_v25  ;;  %2499 = vmatprep.subr.mxu0 %v3806_v2 }
 0x6ec   :  { %1830 = vmatpush1.msra.mxu1 %v3472_v27  ;;  %2500 = vmatpush3.msra.mxu0 %v3475_v28 }
 0x6ed   :  { %1831 = vmatprep.subr.mxu1 %v3478_v29  ;;  %2501 = vmatprep.subr.mxu0 %v3806_v2 }
 0x6ee   :  { %1832 = vmatpush1.msra.mxu1 %v3482_v30  ;;  %2502 = vmatpush3.msra.mxu0 %v3485_v31 }
 0x6ef   :  { %1833 = vmatprep.subr.mxu1 %v3488_v32  ;;  %2503 = vmatprep.subr.mxu0 %v3806_v2 }
 0x6f0   :  { %1834 = vmatpush1.msra.mxu1 %v3492_v33  ;;  %2504 = vmatpush3.msra.mxu0 %v3495_v34  ;;  %v1779_v34 = vrot.slane %v3644_v45, 6 }
 0x6f1   :  { %1835 = vmatprep.subr.mxu1 %v3498_v35  ;;  %2505 = vmatprep.subr.mxu0 %v3806_v2 }
 0x6f2   :  { %1836 = vmatpush1.msra.mxu1 %v3502_v36  ;;  %2506 = vmatpush3.msra.mxu0 %v3505_v37 }
 0x6f3   :  { %1837 = vmatprep.subr.mxu1 %v3508_v38  ;;  %2507 = vmatprep.subr.mxu0 %v3806_v2 }
 0x6f4   :  { %1838 = vmatpush1.msra.mxu1 %v3512_v39  ;;  %2508 = vmatpush3.msra.mxu0 %v3515_v40 }
 0x6f5   :  { %1839 = vmatprep.subr.mxu1 %v3518_v41  ;;  %2509 = vmatprep.subr.mxu0 %v3806_v2 }
 0x6f6   :  { %1840 = vmatpush1.msra.mxu1 %v3857_v10  ;;  %2510 = vmatpush3.msra.mxu0 %v3858_v0 }
 0x6f7   :  { %1841 = vmatprep.subr.mxu1 %v3859_v8  ;;  %2511 = vmatprep.subr.mxu0 %v3806_v2 }
 0x6f8   :  { %1842 = vmatpush1.msra.mxu1 %v3860_v54  ;;  %2512 = vmatpush3.msra.mxu0 %v3861_v62 }
 0x6f9   :  { %1843 = vmatprep.subr.mxu1 %v3862_v5  ;;  %2513 = vmatprep.subr.mxu0 %v3806_v2 }
 0x6fa   :  { %1844 = vmatpush1.msra.mxu1 %v3863_v13  ;;  %1877 = vmatprep.mubr.f32.mxu1 %v3806_v2 }
 0x6fb   :  { %2514 = vmatpush3.msra.mxu0 %v3864_v14  ;;  %2515 = vmatprep.mubr.msk.f32.mxu0 %vm2750_vm0, %v3806_v2 }
 0x79b   :  { %v1676_v58 = vpop.f32.mrf.mxu1  ;;  %v1747_v9 = vpop.f32.mrf.mxu0 }
 0x79c   :  { %v1677_v60 = vadd.f32 %v1676_v58, %v3865_v1  ;;  %v1748_v25 = vadd.f32 %v1747_v9, %v3131_v3 }
 0x79d   :  { %v1678_v11 = vpop.f32.mrf.mxu1  ;;  %v2482_v12 = vpop.f32.mrf.mxu0 }
 0x79e   :  { %v1752_v15 = vrot.slane %v1677_v60, 4  ;;  %v1679_v16 = vadd.f32 %v1678_v11, %v3855_v23  ;;  %v1772_v28 = vrot.slane %v1748_v25, 4 }
 0x7a0   :  { %v1754_v17 = vadd.f32 %v1752_v15, %v3856_v26  ;;  %v1762_v19 = vrot.slane %v1679_v16, 4 }
 0x7a2   :  { %v2081_v18 = vmul.f32 -1.442695, %v1754_v17  ;;  %v1764_v20 = vadd.f32 %v1762_v19, %v3558_v48 }
 0x7a4   :  { %2589 = vpow2.f32 %v2081_v18  ;;  %v2082_v21 = vmul.f32 -1.442695, %v1764_v20 }
 0x7a6   :  { %2591 = vpow2.f32 %v2082_v21 }
 0x7b1   :  { %v2590_v22 = vpop.eup %2589 }
 0x7b2   :  { %v1758_v2 = vadd.f32 1.0, %v2590_v22 }
 0x7b3   :  { %v2592_v24 = vpop.eup %2591 }
 0x7b4   :  { %2593 = vrcp.f32 %v1758_v2  ;;  %v1768_v27 = vadd.f32 1.0, %v2592_v24 }
 0x7b6   :  { %2595 = vrcp.f32 %v1768_v27 }
 0x7c1   :  { %v2594_v29 = vpop.eup %2593 }
 0x7c2   :  { %v1774_v30 = vmul.f32 %v2594_v29, %v1772_v28 }
 0x7c3   :  { %v2596_v32 = vpop.eup %2595 }
 0x7c4   :  { %v1775_v31 = vadd.f32 %v1774_v30, %v3847_v53  ;;  %v1777_v33 = vsub.f32 1.0, %v2596_v32  ;;  %v1781_v37 = vmul.f32 %v2596_v32, %v1779_v34 }
 0x7c6   :  { %2597 = vtanh.f32 %v1775_v31 }
 0x7d3   :  { %v2598_v35 = vpop.eup %2597 }
 0x7d4   :  { %v1778_v36 = vmul.f32 %v2598_v35, %v1777_v33 }
 0x7d6   :  { %v1782_v38 = vadd.f32 %v1781_v37, %v1778_v36 }
 0x7d8   :  { %v1784_v39 = vcombine.high %v1782_v38, %v1782_v38  ;;  %v1811_v40 = vrot.slane %v1782_v38, 4  ;;  %v1982_v54 = vrot.slane %v1782_v38, 6 }
 0x7da   :  { %v1791_v41 = vrot.slane %v1784_v39, %v3139_v4  ;;  %1878 = vmatmul.mubr.f32.vlgmr.msra.gmra.mxu1 %v1811_v40  ;;  %2516 = vmatmul.mubr.f32.vlgmr.msra.gmra.mxu0 %v1811_v40 }
 0x7dc   :  { %v1792_v50 = vcombine.high %v1791_v41, %v1791_v41  ;;  %2083 = vst.sshfl [vmem:[#allocation8 + $0x6] sm:$0x1 pattern:$0x73625140] %v1791_v41 }
 0x7de   :  { %2084 = vst.sshfl [vmem:[#allocation8 + $0xe] sm:$0x1 pattern:$0x73625140] %v1792_v50 }
 0x89a   :  { %v1879_v7 = vpop.f32.mrf.mxu1  ;;  %v1950_v6 = vpop.f32.mrf.mxu0 }
 0x89b   :  { %v1880_v49 = vadd.f32 %v1879_v7, %v3865_v1  ;;  %v1951_v47 = vadd.f32 %v1950_v6, %v3131_v3 }
 0x89c   :  { %v1881_v51 = vpop.f32.mrf.mxu1  ;;  %v2517_v46 = vpop.f32.mrf.mxu0 }
 0x89d   :  { %v1955_v57 = vrot.slane %v1880_v49, 2  ;;  %v1882_v55 = vadd.f32 %v1881_v51, %v3855_v23  ;;  %v1975_v10 = vrot.slane %v1951_v47, 2 }
 0x89f   :  { %v1957_v61 = vadd.f32 %v1955_v57, %v3856_v26  ;;  %v1965_v45 = vrot.slane %v1882_v55, 2 }
 0x8a1   :  { %v2085_v63 = vmul.f32 -1.442695, %v1957_v61  ;;  %v1967_v44 = vadd.f32 %v1965_v45, %v3558_v48 }
 0x8a3   :  { %2599 = vpow2.f32 %v2085_v63  ;;  %v2086_v43 = vmul.f32 -1.442695, %v1967_v44 }
 0x8a5   :  { %2601 = vpow2.f32 %v2086_v43 }
 0x8b0   :  { %v2600_v59 = vpop.eup %2599 }
 0x8b1   :  { %v1961_v52 = vadd.f32 1.0, %v2600_v59 }
 0x8b2   :  { %v2602_v42 = vpop.eup %2601 }
 0x8b3   :  { %2603 = vrcp.f32 %v1961_v52  ;;  %v1971_v56 = vadd.f32 1.0, %v2602_v42 }
 0x8b5   :  { %2605 = vrcp.f32 %v1971_v56 }
 0x8c0   :  { %v2604_v0 = vpop.eup %2603 }
 0x8c1   :  { %v1977_v8 = vmul.f32 %v2604_v0, %v1975_v10 }
 0x8c2   :  { %v2606_v26 = vpop.eup %2605 }
 0x8c3   :  { %v1978_v23 = vadd.f32 %v1977_v8, %v3847_v53  ;;  %v1980_v62 = vsub.f32 1.0, %v2606_v26  ;;  %v1984_v13 = vmul.f32 %v2606_v26, %v1982_v54 }
 0x8c5   :  { %2607 = vtanh.f32 %v1978_v23 }
 0x8d2   :  { %v2608_v48 = vpop.eup %2607 }
 0x8d3   :  { %v1981_v5 = vmul.f32 %v2608_v48, %v1980_v62 }
 0x8d5   :  { %v1985_v14 = vadd.f32 %v1984_v13, %v1981_v5 }
 0x8d7   :  { %v1987_v58 = vcombine.high %v1985_v14, %v1985_v14  ;;  %2016 = vst [vmem:[#allocation2 - $0x6] sm:$0xc0] %v1985_v14  ;;  %2020 = vst [vmem:[#allocation9 - $0x6] sm:$0xc0] %v1985_v14 }
 0x8d8   :  { %2708 = shalt.err (!%p2705_p0)
}
 0x8d9   :  { %2042 = dma.vmem_to_hbm [thread:$0]  %s2040_s28, 32, %s3748_s9, [#allocation10]   ;;  %v1994_v3 = vrot.slane %v1987_v58, %v3139_v4 }
 0x8da   :  { %s2753_s11 = smov [#allocation8]  }
 0x8db   :  { %v1995_v53 = vcombine.high %v1994_v3, %v1994_v3  ;;  %v2002_v9 = vrot.slane %v1994_v3, %v3139_v4  ;;  %s2026_s12 = sshll.u32 %s2753_s11, 4  ;;  %s2027_s12 = int_to_ptr.vmem [resolvable:$true] %s2026_s12 }
 0x8dc   :  { %s2717_s13 = scalar_lea.vmem %s2027_s12, 256  ;;  %p2722_p2 = scmp.lt.s32.totalorder %s2027_s12, %s2027_s12 }
 0x8dd   :  { %v2009_v1 = vrot.slane %v1995_v53, %v3139_v4  ;;  %v2010_v60 = vcombine.high %v2002_v9, %v2002_v9  ;;  %p2718_p1 = scmp.ne.s32.totalorder %s2027_s12, %s2717_s13  ;;  %p2723_p3 = scmp.lt.s32.totalorder %s2717_s13, %s2717_s13 }
 0x8df   :  { %v2011_v11 = vcombine.high %v2009_v1, %v2009_v1  ;;  %2014 = vst [vmem:[#allocation8 + $0x7] sm:$0x1] %v2010_v60  ;;  %p2724_p4 = por %p2723_p3, %p2722_p2 }
 0x8e1   :  { %2015 = vst [vmem:[#allocation8 + $0xf] sm:$0x1] %v2011_v11  ;;  %p2725_p5 = pnand %p2724_p4, %p2718_p1 }
 0x8e3   :  { %2728 = shalt.err (!%p2725_p5)
}
 0x8e4   :  { %s2754_s9 = smov 128   ;;  %s2755_s14 = smov 8  }
 0x8e5   :  { %2032 = dma.vmem_to_hbm [thread:$0]  %s2027_s12, 256, %s3747_s8, [#allocation5], %s2754_s9, %s2754_s9, %s2755_s14  }
 0x8e6   :  { %2741 = dma.done.wait [#allocation5], 256  }
 0x8e7   :  { %2742 = vsyncadd [#allocation5], 4294967040 }
 0x8e8   :  { %2743 = dma.done.wait [#allocation10], 32  }
 0x8e9   :  { %2744 = vsyncadd [#allocation10], 4294967264 }
 0x8ea   :  { %2049 = vsyncpa [#allocation4], 1 }
 0x8eb   :  { %2050 = vsyncpa [#allocation7], 1 }
 0x8ec   :  { %2051 = vsyncpa [#allocation5], 1 }
 0x8ed   :  { %2052 = vsyncpa [#allocation10], 1 }

</bundles_post_ra>
